<compile_context>
chip_gen: v5e
topology: v5e:2x2
jax: 0.10.0
libtpu: 0.0.40
codegen_flags: <defaults>
</compile_context>

<pallas_src>
import functools
import math

import jax
import jax.numpy as jnp
from jax import lax
from jax.experimental import pallas as pl
from jax.experimental.pallas import tpu as pltpu


def _round_up(x, m):
    return -(-x // m) * m


def _fused_upsample_kernel(x_ref, w_ref, b_ref, o_ref, *, taps, nmax, use_im2col):
    """One row strip of one batch element; all 4 output phases, interleaved in place.

    x_ref: (TH + U - 1, Wp, Cin)       input strip incl. halo rows (zero-padded)
    w_ref: per-tap   (4*nmax*nmax, Cin, Cout)     [use_im2col=False]
           per-phase (4, nmax*nmax*Cin, Cout)     [use_im2col=True]
    b_ref: (1, Cout) f32
    o_ref: (TH, 2, Wh, 2*Cout)  with  o[m, rh, j, rw*Cout + c] == y[2m+rh, 2j+rw, c]
    """
    th = o_ref.shape[0]
    wh = o_ref.shape[2]
    cout = o_ref.shape[3] // 2
    cin = x_ref.shape[-1]
    bias = b_ref[...].astype(jnp.float32)                      # (1, Cout)

    for rh in range(2):
        taps_h = taps[rh]
        off_h = dict(taps_h)
        for rw in range(2):
            taps_w = taps[rw]
            off_w = dict(taps_w)
            if use_im2col:
                # Per-phase im2col: one fat-contraction matmul (small-Cin layers).
                pieces = []
                for jh in range(nmax):
                    oh = off_h.get(jh, 0)      # padded tap slots hit zero weight rows
                    for jw in range(nmax):
                        ow = off_w.get(jw, 0)
                        pieces.append(
                            x_ref[oh:oh + th, ow:ow + wh, :].reshape(th * wh, cin))
                patch = pieces[0] if len(pieces) == 1 else jnp.concatenate(pieces, -1)
                acc = jnp.dot(patch, w_ref[rh * 2 + rw],
                              preferred_element_type=jnp.float32)
            else:
                # Zero-skipping per-tap accumulation: keeps MXU fed for Cin >= 128 and
                # avoids the U^2-sized patch copy in VMEM / vregs.
                acc = None
                for jh, oh in taps_h:
                    for jw, ow in taps_w:
                        widx = ((rh * 2 + rw) * nmax + jh) * nmax + jw
                        prod = jnp.dot(
                            x_ref[oh:oh + th, ow:ow + wh, :].reshape(th * wh, cin),
                            w_ref[widx], preferred_element_type=jnp.float32)
                        acc = prod if acc is None else acc + prod
            acc = acc + bias
            # In-kernel phase interleave: row-pair slot rh, lane block rw.
            o_ref[:, rh:rh + 1, :, rw * cout:(rw + 1) * cout] = (
                acc.reshape(th, 1, wh, cout).astype(o_ref.dtype))


@functools.partial(
    jax.jit,
    static_argnames=("padding", "row_tile", "use_bf16_mxu", "contraction",
                     "out_dtype", "channels_last"))
def fused_upsample(x_nchw, weight, bias, padding=0, *, row_tile=None,
                   use_bf16_mxu=False, contraction="auto", out_dtype=None,
                   channels_last=False):
    """x_nchw: (N, Cin, H, W); weight: (Cin, Cout, k, k); bias: (Cout,)."""
    N, Cin, H, W = x_nchw.shape
    in_ch, out_ch, k, k2 = weight.shape
    assert in_ch == Cin and k2 == k
    p = int(padding)
    K = k + 1
    assert 0 <= p <= K - 1, "padding must satisfy 0 <= padding <= kernel_size"

    # ---- fused weight smoothing (k -> k+1 taps), as in the PyTorch module -----------
    multiplier = math.sqrt(2.0 / (in_ch * k * k))
    w = weight.astype(jnp.float32) * multiplier
    wpd = jnp.pad(w, ((0, 0), (0, 0), (1, 1), (1, 1)))
    w_avg = (wpd[:, :, 1:, 1:] + wpd[:, :, :-1, 1:]
             + wpd[:, :, 1:, :-1] + wpd[:, :, :-1, :-1]) / 4.0      # (Cin, Cout, K, K)

    # ---- sub-pixel phase decomposition of conv_transpose2d(stride=2, padding=p) -----
    #   y[2m + r] = sum_j x[m + c_r - j] * w_avg[alpha_r + 2 j]
    Ho = 2 * (H - 1) + K - 2 * p
    Wo = 2 * (W - 1) + K - 2 * p
    assert Ho > 0 and Wo > 0
    Hh, Wh = -(-Ho // 2), -(-Wo // 2)

    phase = []
    for r in (0, 1):
        alpha = (r + p) % 2
        ntap = (K - alpha + 1) // 2
        c = (r + p - alpha) // 2
        phase.append((alpha, ntap, c))
    dmin = min(c - (nt - 1) for (_, nt, c) in phase)
    dmax = max(c for (_, _, c) in phase)
    U = dmax - dmin + 1                    # union tap footprint per spatial axis
    nmax = max(nt for (_, nt, _) in phase)
    taps = tuple(tuple((j, c - j - dmin) for j in range(nt))
                 for (_, nt, c) in phase)

    # Packed per-phase/per-tap weights: exactly K*K real taps, no zero union blocks.
    w_pack = jnp.zeros((2, 2, nmax, nmax, in_ch, out_ch), jnp.float32)
    for rh, (ah, nh, _) in enumerate(phase):
        for rw, (aw, nw, _) in enumerate(phase):
            for jh in range(nh):
                for jw in range(nw):
                    w_pack = w_pack.at[rh, rw, jh, jw].set(
                        w_avg[:, :, ah + 2 * jh, aw + 2 * jw])

    if contraction == "auto":
        use_im2col = in_ch < 128          # fat contraction only where per-tap depth is tiny
    else:
        use_im2col = contraction == "im2col"

    out_dtype = jnp.dtype(x_nchw.dtype) if out_dtype is None else jnp.dtype(out_dtype)
    compute_dtype = jnp.dtype(jnp.bfloat16) if use_bf16_mxu else jnp.dtype(x_nchw.dtype)
    if use_im2col:
        w_oper = w_pack.reshape(4, nmax * nmax * in_ch, out_ch).astype(compute_dtype)
    else:
        w_oper = w_pack.reshape(4 * nmax * nmax, in_ch, out_ch).astype(compute_dtype)
    b_vec = bias.astype(jnp.float32).reshape(1, out_ch)

    # ---- VMEM-budgeted row-strip tiling ----------------------------------------------
    Wh_pad = max(8, _round_up(Wh, 8))          # sublane-aligned output width
    Wp = Wh_pad + U - 1

    try:
        vmem_cap = int(pltpu.get_tpu_info().vmem_capacity_bytes)
    except Exception:                          # conservative fallback (v7x-sized VMEM)
        vmem_cap = 64 * 1024 * 1024
    vmem_limit = max(32 * 1024 * 1024,
                     min(int(0.75 * vmem_cap), vmem_cap - 16 * 1024 * 1024))

    in_isz = jnp.dtype(compute_dtype).itemsize
    out_isz = jnp.dtype(out_dtype).itemsize
    lane = lambda c: _round_up(max(int(c), 1), 128)
    sub = lambda s: _round_up(max(int(s), 1), 8)

    w_bytes = w_oper.shape[0] * sub(w_oper.shape[1]) * lane(w_oper.shape[2]) * in_isz
    single_buffer_w = w_bytes > (2 << 20)      # keep big invariant weights 1-buffered

    in_row = sub(Wp) * lane(in_ch) * in_isz                     # one strip row
    out_row = 2 * sub(Wh_pad) * lane(2 * out_ch) * out_isz      # one output-block row
    n_win = (nmax * nmax) if use_im2col else 2                  # live window copies
    tmp_row = sub(Wh_pad) * (2 * lane(out_ch) * 4 + n_win * lane(in_ch) * in_isz)
    fixed = (w_bytes * (1 if single_buffer_w else 2)
             + 2 * (U - 1) * in_row + (2 << 20))
    per_row = 2 * in_row + 2 * out_row + tmp_row
    budget = vmem_limit - 8 * 1024 * 1024

    if row_tile is None:
        TH = max(1, (budget - fixed) // per_row)
        # TODO(synk): add column tiling for extremely wide / deep inputs where even a
        # one-row strip exceeds the per-step VMEM budget.
    else:
        TH = int(row_tile)
    TH = int(max(1, min(TH, Hh)))
    n_strips = -(-Hh // TH)
    TH = -(-Hh // n_strips)                    # balance strips
    if N * n_strips < 2 and Hh >= 2:           # keep both v7x TensorCores busy
        n_strips, TH = 2, -(-Hh // 2)
    Hh_pad = n_strips * TH

    # ---- shifted, zero-padded NHWC input and per-strip slabs (halo folded in) --------
    Hrows = Hh_pad + U - 1
    xt = jnp.transpose(x_nchw, (0, 2, 3, 1)).astype(compute_dtype)   # (N, H, W, Cin)
    pb = max(0, -dmin)
    pa_h = max(0, Hrows + dmin - H)
    pa_w = max(0, Wp + dmin - W)
    xpad = jnp.pad(xt, ((0, 0), (pb, pa_h), (pb, pa_w), (0, 0)))
    xs = lax.slice(xpad, (0, pb + dmin, pb + dmin, 0),
                   (N, pb + dmin + Hrows, pb + dmin + Wp, Cin))
    strip_rows = TH + U - 1
    xstrips = jnp.stack(
        [lax.slice_in_dim(xs, s * TH, s * TH + strip_rows, axis=1)
         for s in range(n_strips)], axis=1)     # (N, n_strips, TH+U-1, Wp, Cin)

    kernel = functools.partial(_fused_upsample_kernel, taps=taps, nmax=nmax,
                               use_im2col=use_im2col)

    def _w_spec():
        shape = w_oper.shape
        imap = lambda n, s: (0,) * len(shape)
        if single_buffer_w:
            try:   # single-buffer the grid-invariant weight (big VMEM win on v7x)
                return pl.BlockSpec(shape, imap, pipeline_mode=pl.Buffered(1))
            except Exception:
                pass
        return pl.BlockSpec(shape, imap)

    C2 = 2 * out_ch
    # TODO(synk): for Cout <= 16 repack the output so the minor dim is a multiple of
    # 128 lanes (avoids masked vst); not needed for real StyleGAN channel counts.
    phases = pl.pallas_call(
        kernel,
        out_shape=jax.ShapeDtypeStruct((N, Hh_pad, 2, Wh_pad, C2), out_dtype),
        grid_spec=pltpu.PrefetchScalarGridSpec(
            num_scalar_prefetch=0,
            grid=(N, n_strips),
            in_specs=[
                pl.BlockSpec((None, None, strip_rows, Wp, Cin),
                             lambda n, s: (n, s, 0, 0, 0)),
                _w_spec(),
                pl.BlockSpec((1, out_ch), lambda n, s: (0, 0)),
            ],
            out_specs=pl.BlockSpec((None, TH, 2, Wh_pad, C2),
                                   lambda n, s: (n, s, 0, 0, 0)),
        ),
        compiler_params=pltpu.CompilerParams(
            dimension_semantics=("parallel", "parallel"),
            vmem_limit_bytes=int(vmem_limit)),
    )(xstrips, w_oper, b_vec)

    # ---- free pixel-shuffle (contiguous reshape) + crop; one NHWC->NCHW transpose ----
    out_nhwc = phases.reshape(N, 2 * Hh_pad, 2 * Wh_pad, out_ch)[:, :Ho, :Wo, :]
    if channels_last:
        return out_nhwc
    return jnp.transpose(out_nhwc, (0, 3, 1, 2))


def _reference(x_nchw, weight, bias, padding):
    """Pure-JAX reference using XLA's dilated conv (== conv_transpose2d)."""
    in_ch, out_ch, k, _ = weight.shape
    multiplier = math.sqrt(2.0 / (in_ch * k * k))
    w = weight * multiplier
    wpd = jnp.pad(w, ((0, 0), (0, 0), (1, 1), (1, 1)))
    w_avg = (wpd[:, :, 1:, 1:] + wpd[:, :, :-1, 1:]
             + wpd[:, :, 1:, :-1] + wpd[:, :, :-1, :-1]) / 4.0
    K = k + 1
    rhs = jnp.transpose(w_avg[:, :, ::-1, ::-1], (1, 0, 2, 3))      # OIHW
    pc = K - 1 - padding
    out = lax.conv_general_dilated(
        x_nchw, rhs, window_strides=(1, 1),
        padding=[(pc, pc), (pc, pc)], lhs_dilation=(2, 2),
        dimension_numbers=("NCHW", "OIHW", "NCHW"))
    return out + bias[None, :, None, None]


if __name__ == "__main__":
    key = jax.random.PRNGKey(0)
    kx, kw, kb, kw2 = jax.random.split(key, 4)

    in_ch, out_ch = 4, 4
    x = jax.random.normal(kx, (2, in_ch, 16, 16), jnp.float32)          # NCHW input
    w3 = jax.random.normal(kw, (in_ch, out_ch, 3, 3), jnp.float32)
    w2 = jax.random.normal(kw2, (in_ch, out_ch, 2, 2), jnp.float32)
    b = 0.1 * jax.random.normal(kb, (out_ch,), jnp.float32)

    def check(out, ref, shape, atol, rtol):
        out = jax.block_until_ready(out)
        assert out.shape == shape, out.shape
        err = float(jnp.max(jnp.abs(out.astype(jnp.float32) - ref)))
        assert jnp.allclose(out.astype(jnp.float32), ref, atol=atol, rtol=rtol), err

    ref31 = _reference(x, w3, b, 1)
    ref30 = _reference(x, w3, b, 0)
    ref20 = _reference(x, w2, b, 0)

    # im2col (small-Cin) path; row_tile=8 forces 2 row strips (halo handling).
    check(fused_upsample(x, w3, b, padding=1, row_tile=8),
          ref31, (2, out_ch, 32, 32), 2e-4, 2e-4)
    # per-tap zero-skipping path, auto VMEM-budgeted strip.
    check(fused_upsample(x, w3, b, padding=1, contraction="per_tap"),
          ref31, (2, out_ch, 32, 32), 2e-4, 2e-4)
    # padding=0: different phase/tap structure, Wh padded to a multiple of 8 + crop.
    check(fused_upsample(x, w3, b, padding=0, row_tile=8),
          ref30, (2, out_ch, 34, 34), 2e-4, 2e-4)
    # even kernel size (K odd -> ragged per-phase tap counts), both contraction paths.
    check(fused_upsample(x, w2, b, padding=0, contraction="per_tap", row_tile=8),
          ref20, (2, out_ch, 33, 33), 2e-4, 2e-4)
    check(fused_upsample(x, w2, b, padding=0, contraction="im2col"),
          ref20, (2, out_ch, 33, 33), 2e-4, 2e-4)
    # bf16 MXU operands (f32 accumulation) -- inference fast path, looser tolerance.
    check(fused_upsample(x, w3, b, padding=1, use_bf16_mxu=True,
                         contraction="per_tap", row_tile=8),
          ref31, (2, out_ch, 32, 32), 5e-2, 5e-2)

    print("KERNEL_OK")
</pallas_src>

<mosaic_0001>
module attributes {stable_mosaic.version = 11 : i64} {
  func.func @_fused_upsample_kernel(%arg0: i32, %arg1: i32, %arg2: memref<1x1x10x18x4xf32, #tpu.memory_space<vmem>>, %arg3: memref<4x16x4xf32, #tpu.memory_space<vmem>>, %arg4: memref<1x4xf32, #tpu.memory_space<vmem>>, %arg5: memref<1x8x2x16x8xf32, #tpu.memory_space<vmem>>) attributes {dimension_semantics = [#tpu.dimension_semantics<parallel>, #tpu.dimension_semantics<parallel>], iteration_bounds = array<i64: 2, 2>, scalar_prefetch = 0 : i64, scratch_operands = 0 : i64, tpu.core_type = #tpu.core_type<tc>, window_params = [{transform_indices = @transform_0, window_bounds = array<i64: 1, 1, 10, 18, 4>}, {pipeline_mode = #tpu.pipeline_mode<synchronous>, transform_indices = @transform_1, window_bounds = array<i64: 4, 16, 4>}, {pipeline_mode = #tpu.pipeline_mode<synchronous>, transform_indices = @transform_2, window_bounds = array<i64: 1, 4>}, {transform_indices = @transform_3, window_bounds = array<i64: 1, 8, 2, 16, 8>}]} {
    %c0 = arith.constant 0 : index
    %c0_0 = arith.constant 0 : index
    %0 = vector.load %arg4[%c0, %c0_0] : memref<1x4xf32, #tpu.memory_space<vmem>>, vector<1x4xf32>
    %c0_1 = arith.constant 0 : index
    %c0_2 = arith.constant 0 : index
    %c1 = arith.constant 1 : index
    %c1_3 = arith.constant 1 : index
    %c0_4 = arith.constant 0 : index
    %1 = vector.load %arg2[%c0_1, %c0_2, %c1, %c1_3, %c0_4] : memref<1x1x10x18x4xf32, #tpu.memory_space<vmem>>, vector<1x1x8x16x4xf32>
    %2 = vector.shape_cast %1 : vector<1x1x8x16x4xf32> to vector<8x16x4xf32>
    %3 = vector.shape_cast %2 : vector<8x16x4xf32> to vector<128x4xf32>
    %c0_5 = arith.constant 0 : index
    %c0_6 = arith.constant 0 : index
    %c1_7 = arith.constant 1 : index
    %c0_8 = arith.constant 0 : index
    %c0_9 = arith.constant 0 : index
    %4 = vector.load %arg2[%c0_5, %c0_6, %c1_7, %c0_8, %c0_9] : memref<1x1x10x18x4xf32, #tpu.memory_space<vmem>>, vector<1x1x8x16x4xf32>
    %5 = vector.shape_cast %4 : vector<1x1x8x16x4xf32> to vector<8x16x4xf32>
    %6 = vector.shape_cast %5 : vector<8x16x4xf32> to vector<128x4xf32>
    %c0_10 = arith.constant 0 : index
    %c0_11 = arith.constant 0 : index
    %c0_12 = arith.constant 0 : index
    %c1_13 = arith.constant 1 : index
    %c0_14 = arith.constant 0 : index
    %7 = vector.load %arg2[%c0_10, %c0_11, %c0_12, %c1_13, %c0_14] : memref<1x1x10x18x4xf32, #tpu.memory_space<vmem>>, vector<1x1x8x16x4xf32>
    %8 = vector.shape_cast %7 : vector<1x1x8x16x4xf32> to vector<8x16x4xf32>
    %9 = vector.shape_cast %8 : vector<8x16x4xf32> to vector<128x4xf32>
    %c0_15 = arith.constant 0 : index
    %c0_16 = arith.constant 0 : index
    %c0_17 = arith.constant 0 : index
    %c0_18 = arith.constant 0 : index
    %c0_19 = arith.constant 0 : index
    %10 = vector.load %arg2[%c0_15, %c0_16, %c0_17, %c0_18, %c0_19] : memref<1x1x10x18x4xf32, #tpu.memory_space<vmem>>, vector<1x1x8x16x4xf32>
    %11 = vector.shape_cast %10 : vector<1x1x8x16x4xf32> to vector<8x16x4xf32>
    %12 = vector.shape_cast %11 : vector<8x16x4xf32> to vector<128x4xf32>
    %13 = tpu.concatenate %3, %6, %9, %12 in 1 : vector<128x4xf32>, vector<128x4xf32>, vector<128x4xf32>, vector<128x4xf32> -> vector<128x16xf32>
    %c0_20 = arith.constant 0 : index
    %c0_21 = arith.constant 0 : index
    %c0_22 = arith.constant 0 : index
    %14 = vector.load %arg3[%c0_20, %c0_21, %c0_22] : memref<4x16x4xf32, #tpu.memory_space<vmem>>, vector<1x16x4xf32>
    %15 = vector.shape_cast %14 : vector<1x16x4xf32> to vector<16x4xf32>
    %cst = arith.constant dense<0.000000e+00> : vector<128x4xf32>
    %16 = tpu.matmul %13, %15, %cst {dimension_numbers = #tpu.dot_dimension_numbers<[1], [0], [0], [1], [0, 0, 1, 1], [], []>} : vector<128x16xf32>, vector<16x4xf32>, vector<128x4xf32> -> vector<128x4xf32>
    %17 = vector.broadcast %0 : vector<1x4xf32> to vector<128x4xf32>
    %18 = arith.addf %16, %17 : vector<128x4xf32>
    %19 = vector.shape_cast %18 : vector<128x4xf32> to vector<8x1x16x4xf32>
    %c0_23 = arith.constant 0 : index
    %c0_24 = arith.constant 0 : index
    %c0_25 = arith.constant 0 : index
    %c0_26 = arith.constant 0 : index
    %c0_27 = arith.constant 0 : index
    %20 = vector.load %arg5[%c0_23, %c0_24, %c0_25, %c0_26, %c0_27] : memref<1x8x2x16x8xf32, #tpu.memory_space<vmem>>, vector<1x8x1x16x4xf32>
    %21 = vector.shape_cast %20 : vector<1x8x1x16x4xf32> to vector<8x1x16x4xf32>
    %22 = vector.shape_cast %19 : vector<8x1x16x4xf32> to vector<1x8x1x16x4xf32>
    tpu.vector_store %arg5[%c0_23, %c0_24, %c0_25, %c0_26, %c0_27], %22 {strides = array<i32>} : memref<1x8x2x16x8xf32, #tpu.memory_space<vmem>>, vector<1x8x1x16x4xf32>,
    %c0_28 = arith.constant 0 : index
    %c0_29 = arith.constant 0 : index
    %c1_30 = arith.constant 1 : index
    %c2 = arith.constant 2 : index
    %c0_31 = arith.constant 0 : index
    %23 = vector.load %arg2[%c0_28, %c0_29, %c1_30, %c2, %c0_31] : memref<1x1x10x18x4xf32, #tpu.memory_space<vmem>>, vector<1x1x8x16x4xf32>
    %24 = vector.shape_cast %23 : vector<1x1x8x16x4xf32> to vector<8x16x4xf32>
    %25 = vector.shape_cast %24 : vector<8x16x4xf32> to vector<128x4xf32>
    %c0_32 = arith.constant 0 : index
    %c0_33 = arith.constant 0 : index
    %c1_34 = arith.constant 1 : index
    %c1_35 = arith.constant 1 : index
    %c0_36 = arith.constant 0 : index
    %26 = vector.load %arg2[%c0_32, %c0_33, %c1_34, %c1_35, %c0_36] : memref<1x1x10x18x4xf32, #tpu.memory_space<vmem>>, vector<1x1x8x16x4xf32>
    %27 = vector.shape_cast %26 : vector<1x1x8x16x4xf32> to vector<8x16x4xf32>
    %28 = vector.shape_cast %27 : vector<8x16x4xf32> to vector<128x4xf32>
    %c0_37 = arith.constant 0 : index
    %c0_38 = arith.constant 0 : index
    %c0_39 = arith.constant 0 : index
    %c2_40 = arith.constant 2 : index
    %c0_41 = arith.constant 0 : index
    %29 = vector.load %arg2[%c0_37, %c0_38, %c0_39, %c2_40, %c0_41] : memref<1x1x10x18x4xf32, #tpu.memory_space<vmem>>, vector<1x1x8x16x4xf32>
    %30 = vector.shape_cast %29 : vector<1x1x8x16x4xf32> to vector<8x16x4xf32>
    %31 = vector.shape_cast %30 : vector<8x16x4xf32> to vector<128x4xf32>
    %c0_42 = arith.constant 0 : index
    %c0_43 = arith.constant 0 : index
    %c0_44 = arith.constant 0 : index
    %c1_45 = arith.constant 1 : index
    %c0_46 = arith.constant 0 : index
    %32 = vector.load %arg2[%c0_42, %c0_43, %c0_44, %c1_45, %c0_46] : memref<1x1x10x18x4xf32, #tpu.memory_space<vmem>>, vector<1x1x8x16x4xf32>
    %33 = vector.shape_cast %32 : vector<1x1x8x16x4xf32> to vector<8x16x4xf32>
    %34 = vector.shape_cast %33 : vector<8x16x4xf32> to vector<128x4xf32>
    %35 = tpu.concatenate %25, %28, %31, %34 in 1 : vector<128x4xf32>, vector<128x4xf32>, vector<128x4xf32>, vector<128x4xf32> -> vector<128x16xf32>
    %c1_47 = arith.constant 1 : index
    %c0_48 = arith.constant 0 : index
    %c0_49 = arith.constant 0 : index
    %36 = vector.load %arg3[%c1_47, %c0_48, %c0_49] : memref<4x16x4xf32, #tpu.memory_space<vmem>>, vector<1x16x4xf32>
    %37 = vector.shape_cast %36 : vector<1x16x4xf32> to vector<16x4xf32>
    %cst_50 = arith.constant dense<0.000000e+00> : vector<128x4xf32>
    %38 = tpu.matmul %35, %37, %cst_50 {dimension_numbers = #tpu.dot_dimension_numbers<[1], [0], [0], [1], [0, 0, 1, 1], [], []>} : vector<128x16xf32>, vector<16x4xf32>, vector<128x4xf32> -> vector<128x4xf32>
    %39 = vector.broadcast %0 : vector<1x4xf32> to vector<128x4xf32>
    %40 = arith.addf %38, %39 : vector<128x4xf32>
    %41 = vector.shape_cast %40 : vector<128x4xf32> to vector<8x1x16x4xf32>
    %c0_51 = arith.constant 0 : index
    %c0_52 = arith.constant 0 : index
    %c0_53 = arith.constant 0 : index
    %c0_54 = arith.constant 0 : index
    %c4 = arith.constant 4 : index
    %42 = vector.load %arg5[%c0_51, %c0_52, %c0_53, %c0_54, %c4] : memref<1x8x2x16x8xf32, #tpu.memory_space<vmem>>, vector<1x8x1x16x4xf32>
    %43 = vector.shape_cast %42 : vector<1x8x1x16x4xf32> to vector<8x1x16x4xf32>
    %44 = vector.shape_cast %41 : vector<8x1x16x4xf32> to vector<1x8x1x16x4xf32>
    tpu.vector_store %arg5[%c0_51, %c0_52, %c0_53, %c0_54, %c4], %44 {strides = array<i32>} : memref<1x8x2x16x8xf32, #tpu.memory_space<vmem>>, vector<1x8x1x16x4xf32>,
    %c0_55 = arith.constant 0 : index
    %c0_56 = arith.constant 0 : index
    %c2_57 = arith.constant 2 : index
    %c1_58 = arith.constant 1 : index
    %c0_59 = arith.constant 0 : index
    %45 = vector.load %arg2[%c0_55, %c0_56, %c2_57, %c1_58, %c0_59] : memref<1x1x10x18x4xf32, #tpu.memory_space<vmem>>, vector<1x1x8x16x4xf32>
    %46 = vector.shape_cast %45 : vector<1x1x8x16x4xf32> to vector<8x16x4xf32>
    %47 = vector.shape_cast %46 : vector<8x16x4xf32> to vector<128x4xf32>
    %c0_60 = arith.constant 0 : index
    %c0_61 = arith.constant 0 : index
    %c2_62 = arith.constant 2 : index
    %c0_63 = arith.constant 0 : index
    %c0_64 = arith.constant 0 : index
    %48 = vector.load %arg2[%c0_60, %c0_61, %c2_62, %c0_63, %c0_64] : memref<1x1x10x18x4xf32, #tpu.memory_space<vmem>>, vector<1x1x8x16x4xf32>
    %49 = vector.shape_cast %48 : vector<1x1x8x16x4xf32> to vector<8x16x4xf32>
    %50 = vector.shape_cast %49 : vector<8x16x4xf32> to vector<128x4xf32>
    %c0_65 = arith.constant 0 : index
    %c0_66 = arith.constant 0 : index
    %c1_67 = arith.constant 1 : index
    %c1_68 = arith.constant 1 : index
    %c0_69 = arith.constant 0 : index
    %51 = vector.load %arg2[%c0_65, %c0_66, %c1_67, %c1_68, %c0_69] : memref<1x1x10x18x4xf32, #tpu.memory_space<vmem>>, vector<1x1x8x16x4xf32>
    %52 = vector.shape_cast %51 : vector<1x1x8x16x4xf32> to vector<8x16x4xf32>
    %53 = vector.shape_cast %52 : vector<8x16x4xf32> to vector<128x4xf32>
    %c0_70 = arith.constant 0 : index
    %c0_71 = arith.constant 0 : index
    %c1_72 = arith.constant 1 : index
    %c0_73 = arith.constant 0 : index
    %c0_74 = arith.constant 0 : index
    %54 = vector.load %arg2[%c0_70, %c0_71, %c1_72, %c0_73, %c0_74] : memref<1x1x10x18x4xf32, #tpu.memory_space<vmem>>, vector<1x1x8x16x4xf32>
    %55 = vector.shape_cast %54 : vector<1x1x8x16x4xf32> to vector<8x16x4xf32>
    %56 = vector.shape_cast %55 : vector<8x16x4xf32> to vector<128x4xf32>
    %57 = tpu.concatenate %47, %50, %53, %56 in 1 : vector<128x4xf32>, vector<128x4xf32>, vector<128x4xf32>, vector<128x4xf32> -> vector<128x16xf32>
    %c2_75 = arith.constant 2 : index
    %c0_76 = arith.constant 0 : index
    %c0_77 = arith.constant 0 : index
    %58 = vector.load %arg3[%c2_75, %c0_76, %c0_77] : memref<4x16x4xf32, #tpu.memory_space<vmem>>, vector<1x16x4xf32>
    %59 = vector.shape_cast %58 : vector<1x16x4xf32> to vector<16x4xf32>
    %cst_78 = arith.constant dense<0.000000e+00> : vector<128x4xf32>
    %60 = tpu.matmul %57, %59, %cst_78 {dimension_numbers = #tpu.dot_dimension_numbers<[1], [0], [0], [1], [0, 0, 1, 1], [], []>} : vector<128x16xf32>, vector<16x4xf32>, vector<128x4xf32> -> vector<128x4xf32>
    %61 = vector.broadcast %0 : vector<1x4xf32> to vector<128x4xf32>
    %62 = arith.addf %60, %61 : vector<128x4xf32>
    %63 = vector.shape_cast %62 : vector<128x4xf32> to vector<8x1x16x4xf32>
    %c0_79 = arith.constant 0 : index
    %c0_80 = arith.constant 0 : index
    %c1_81 = arith.constant 1 : index
    %c0_82 = arith.constant 0 : index
    %c0_83 = arith.constant 0 : index
    %64 = vector.load %arg5[%c0_79, %c0_80, %c1_81, %c0_82, %c0_83] : memref<1x8x2x16x8xf32, #tpu.memory_space<vmem>>, vector<1x8x1x16x4xf32>
    %65 = vector.shape_cast %64 : vector<1x8x1x16x4xf32> to vector<8x1x16x4xf32>
    %66 = vector.shape_cast %63 : vector<8x1x16x4xf32> to vector<1x8x1x16x4xf32>
    tpu.vector_store %arg5[%c0_79, %c0_80, %c1_81, %c0_82, %c0_83], %66 {strides = array<i32>} : memref<1x8x2x16x8xf32, #tpu.memory_space<vmem>>, vector<1x8x1x16x4xf32>,
    %c0_84 = arith.constant 0 : index
    %c0_85 = arith.constant 0 : index
    %c2_86 = arith.constant 2 : index
    %c2_87 = arith.constant 2 : index
    %c0_88 = arith.constant 0 : index
    %67 = vector.load %arg2[%c0_84, %c0_85, %c2_86, %c2_87, %c0_88] : memref<1x1x10x18x4xf32, #tpu.memory_space<vmem>>, vector<1x1x8x16x4xf32>
    %68 = vector.shape_cast %67 : vector<1x1x8x16x4xf32> to vector<8x16x4xf32>
    %69 = vector.shape_cast %68 : vector<8x16x4xf32> to vector<128x4xf32>
    %c0_89 = arith.constant 0 : index
    %c0_90 = arith.constant 0 : index
    %c2_91 = arith.constant 2 : index
    %c1_92 = arith.constant 1 : index
    %c0_93 = arith.constant 0 : index
    %70 = vector.load %arg2[%c0_89, %c0_90, %c2_91, %c1_92, %c0_93] : memref<1x1x10x18x4xf32, #tpu.memory_space<vmem>>, vector<1x1x8x16x4xf32>
    %71 = vector.shape_cast %70 : vector<1x1x8x16x4xf32> to vector<8x16x4xf32>
    %72 = vector.shape_cast %71 : vector<8x16x4xf32> to vector<128x4xf32>
    %c0_94 = arith.constant 0 : index
    %c0_95 = arith.constant 0 : index
    %c1_96 = arith.constant 1 : index
    %c2_97 = arith.constant 2 : index
    %c0_98 = arith.constant 0 : index
    %73 = vector.load %arg2[%c0_94, %c0_95, %c1_96, %c2_97, %c0_98] : memref<1x1x10x18x4xf32, #tpu.memory_space<vmem>>, vector<1x1x8x16x4xf32>
    %74 = vector.shape_cast %73 : vector<1x1x8x16x4xf32> to vector<8x16x4xf32>
    %75 = vector.shape_cast %74 : vector<8x16x4xf32> to vector<128x4xf32>
    %c0_99 = arith.constant 0 : index
    %c0_100 = arith.constant 0 : index
    %c1_101 = arith.constant 1 : index
    %c1_102 = arith.constant 1 : index
    %c0_103 = arith.constant 0 : index
    %76 = vector.load %arg2[%c0_99, %c0_100, %c1_101, %c1_102, %c0_103] : memref<1x1x10x18x4xf32, #tpu.memory_space<vmem>>, vector<1x1x8x16x4xf32>
    %77 = vector.shape_cast %76 : vector<1x1x8x16x4xf32> to vector<8x16x4xf32>
    %78 = vector.shape_cast %77 : vector<8x16x4xf32> to vector<128x4xf32>
    %79 = tpu.concatenate %69, %72, %75, %78 in 1 : vector<128x4xf32>, vector<128x4xf32>, vector<128x4xf32>, vector<128x4xf32> -> vector<128x16xf32>
    %c3 = arith.constant 3 : index
    %c0_104 = arith.constant 0 : index
    %c0_105 = arith.constant 0 : index
    %80 = vector.load %arg3[%c3, %c0_104, %c0_105] : memref<4x16x4xf32, #tpu.memory_space<vmem>>, vector<1x16x4xf32>
    %81 = vector.shape_cast %80 : vector<1x16x4xf32> to vector<16x4xf32>
    %cst_106 = arith.constant dense<0.000000e+00> : vector<128x4xf32>
    %82 = tpu.matmul %79, %81, %cst_106 {dimension_numbers = #tpu.dot_dimension_numbers<[1], [0], [0], [1], [0, 0, 1, 1], [], []>} : vector<128x16xf32>, vector<16x4xf32>, vector<128x4xf32> -> vector<128x4xf32>
    %83 = vector.broadcast %0 : vector<1x4xf32> to vector<128x4xf32>
    %84 = arith.addf %82, %83 : vector<128x4xf32>
    %85 = vector.shape_cast %84 : vector<128x4xf32> to vector<8x1x16x4xf32>
    %c0_107 = arith.constant 0 : index
    %c0_108 = arith.constant 0 : index
    %c1_109 = arith.constant 1 : index
    %c0_110 = arith.constant 0 : index
    %c4_111 = arith.constant 4 : index
    %86 = vector.load %arg5[%c0_107, %c0_108, %c1_109, %c0_110, %c4_111] : memref<1x8x2x16x8xf32, #tpu.memory_space<vmem>>, vector<1x8x1x16x4xf32>
    %87 = vector.shape_cast %86 : vector<1x8x1x16x4xf32> to vector<8x1x16x4xf32>
    %88 = vector.shape_cast %85 : vector<8x1x16x4xf32> to vector<1x8x1x16x4xf32>
    tpu.vector_store %arg5[%c0_107, %c0_108, %c1_109, %c0_110, %c4_111], %88 {strides = array<i32>} : memref<1x8x2x16x8xf32, #tpu.memory_space<vmem>>, vector<1x8x1x16x4xf32>,
    return
  }
  func.func @transform_0(%arg0: i32, %arg1: i32) -> (i32, i32, i32, i32, i32) {
    %c0_i32 = arith.constant 0 : i32
    %c0_i32_0 = arith.constant 0 : i32
    %c0_i32_1 = arith.constant 0 : i32
    %c0_i32_2 = arith.constant 0 : i32
    return %arg0, %arg1, %c0_i32, %c0_i32_0, %c0_i32_1 : i32, i32, i32, i32, i32
  }
  func.func @transform_1(%arg0: i32, %arg1: i32) -> (i32, i32, i32) {
    %c0_i32 = arith.constant 0 : i32
    %c0_i32_0 = arith.constant 0 : i32
    %c0_i32_1 = arith.constant 0 : i32
    %c0_i32_2 = arith.constant 0 : i32
    return %c0_i32, %c0_i32_0, %c0_i32_1 : i32, i32, i32
  }
  func.func @transform_2(%arg0: i32, %arg1: i32) -> (i32, i32) {
    %c0_i32 = arith.constant 0 : i32
    %c0_i32_0 = arith.constant 0 : i32
    %c0_i32_1 = arith.constant 0 : i32
    return %c0_i32, %c0_i32_0 : i32, i32
  }
  func.func @transform_3(%arg0: i32, %arg1: i32) -> (i32, i32, i32, i32, i32) {
    %c0_i32 = arith.constant 0 : i32
    %c0_i32_0 = arith.constant 0 : i32
    %c0_i32_1 = arith.constant 0 : i32
    %c0_i32_2 = arith.constant 0 : i32
    return %arg0, %arg1, %c0_i32, %c0_i32_0, %c0_i32_1 : i32, i32, i32, i32, i32
  }
}

</mosaic_0001>

<bundles_post_ra>
// kernel: fused_upsample.1
= control target key start
LH: loop header
LB: loop body
LE: loop exit
PB: predicated region body
PF: predicated region fallthrough
CT: control target
= control target key end

     0   :  { %s2608_s12 = smov 0   ;;  %s2610_s13 = smov 0   ;;  %s4006_s0 = inlined_call_operand.vmem [shape: f32[2,2,10,18,4], index: 0, kind: input, shape index: {}]   ;;  %s4007_s1 = inlined_call_operand.vmem [shape: f32[4,16,4], index: 1, kind: input, shape index: {}]   ;;  %s4008_s2 = inlined_call_operand.vmem [shape: f32[1,4], index: 2, kind: input, shape index: {}]   ;;  %s4009_s3 = inlined_call_operand.vmem [shape: f32[2,16,2,16,8], index: 3, kind: output, shape index: {}]  }
   0x1   :  { %s2612_s14 = smov 0   ;;  %s2614_s15 = smov 0  }
   0x2   :  { %s2616_s16 = smov 0  }
   0x3 LB: > { %s22_s17 = sadd.s32 1, %s2575_s14  ;;  %s25_s18 = sadd.s32 1, %s2579_s15  ;;  %s2583_s16 = sphi %s2616_s16, %s13_s16   ;;  %s2579_s15 = sphi %s2614_s15, %s4041_s15   ;;  %s2575_s14 = sphi %s2612_s14, %s4040_s14   ;;  %s2571_s13 = sphi %s2610_s13, %s4039_s13   ;;  %s2567_s12 = sphi %s2608_s12, %s4038_s12  }
   0x4   : > { %p23_p0 = scmp.ge.s32.totalorder %s22_s17, 2  ;;  %p2196_p1 = scmp.ge.s32.totalorder %s2583_s16, 1 }
   0x5   : > { %p157_p2 = scmp.lt.s32.totalorder %s2583_s16, 5 }
   0x6   : > { %s4043_s17 = smov (%p23_p0, %s22_s17), 0  ;;  %s4045_s18 = smov (!%p23_p0, %s25_s18), %s2579_s15 }
   0x7   : > { %p158_p3 = pnand %p2196_p1, %p157_p2  ;;  %p27_p4 = scmp.ge.s32.totalorder %s4045_s18, 2 }
   0x9   : > { %s4047_s18 = smov (%p27_p4, %s4045_s18), 0  ;;  %161 = sbr.rel (%p158_p3) target bundleno = 1101 (0x44d), region = 32 }
   0xe   : > { %p190_p5 = scmp.lt.s32.totalorder %s2571_s13, 1  ;;  %p192_p6 = scmp.lt.s32.totalorder %s2567_s12, 1  ;;  %v520_v46 = vld [vmem:[%s4007_s1 + $0x8] sm:$0xff]  ;;  %v519_v50 = vld [vmem:[%s4007_s1] sm:$0xff]  ;;  %vm468_vm0 = vcmask 31744   ;;  %vm502_vm1 = vcmask 97280  }
   0xf   : > { %s2585_s27 = smov 4   ;;  %s2586_s28 = smov 8   ;;  %587 = vmatpush.msra.mxu0 %v520_v46  ;;  %vm485_vm2 = vcmask 64512   ;;  %vm524_vm3 = vcmask 130048   ;;  %vm1138_vm4 = vcmask 64544  }
  0x10   : > { %s4049_s13 = smov (!%p190_p5, %s2571_s13), 1  ;;  %s2587_s29 = smov 12  }
  0x11   : > { %s193_s19 = scalar_select %p192_p6, %s2567_s12, 1  ;;  %588 = vmatpush.msra.mxu0 %v519_v50 }
  0x12   : > { %s2499_s20 = smul.u32 60, %s4049_s13  ;;  %s2198_s11 = sshll.u32 %s2567_s12, 3 }
  0x13   : > { %s2498_s21 = smul.u32 30, %s193_s19  ;;  %p202_p7 = scmp.lt.s32.totalorder %s2198_s11, 15 }
  0x14   : > { %s2200_s19 = sshll.u32 %s4049_s13, 6 }
  0x15   : > { %s196_s22 = sadd.s32 %s2499_s20, %s2498_s21  ;;  %s4051_s11 = smov (!%p202_p7, %s2198_s11), 15 }
  0x16   : > { %s2197_s23 = sshll.u32 %s196_s22, 3  ;;  %s2199_s12 = sshll.u32 %s4051_s11, 2 }
  0x17   : > { %s2648_s26 = scalar_lea.vmem %s4006_s0, %s2197_s23  ;;  %s206_s20 = sadd.s32 %s2200_s19, %s2199_s12 }
  0x18   : > { %v2651_v0 = vld [vmem:[%s2648_s26 + $0x48] sm:$0xff]  ;;  %v2654_v1 = vld [vmem:[%s2648_s26 + $0x30] sm:$0xff]  ;;  %v2657_v2 = vld [vmem:[%s2648_s26 + $0x18] sm:$0xff]  ;;  %s2201_s21 = sshll.u32 %s206_s20, 3 }
  0x19   : > { %300 = vrot.lane.b32.xlu2 %v2651_v0, %s2585_s27  ;;  %296 = vrot.lane.b32.xlu1 %v2654_v1, %s2585_s27  ;;  %v2666_v3 = vld [vmem:[%s2648_s26 + $0x50] sm:$0xff]  ;;  %v2669_v4 = vld [vmem:[%s2648_s26 + $0x38] sm:$0xff]  ;;  %s3198_s25 = scalar_lea.vmem %s4009_s3, %s2201_s21 }
  0x1a   : > { %292 = vrot.lane.b32.xlu0 %v2657_v2, %s2585_s27  ;;  %v2219_v5 = vld [vmem:[%s2648_s26 + $0x20] sm:$0xff]  ;;  %v2678_v6 = vld [vmem:[%s2648_s26 + $0x78] sm:$0xff]  ;;  %v2681_v7 = vld [vmem:[%s2648_s26 + $0x68] sm:$0xff] }
  0x1b   : > { %v2684_v8 = vld [vmem:[%s2648_s26 + $0x60] sm:$0xff]  ;;  %v2693_v9 = vld [vmem:[%s2648_s26 + $0x98] sm:$0xff]  ;;  %v2228_v10 = vld [vmem:[%s2648_s26 + $0x90] sm:$0xff] }
  0x1c   : > { %v2227_v11 = vld [vmem:[%s2648_s26 + $0x80] sm:$0xff]  ;;  %v2231_v13 = vld [vmem:[%s2648_s26 + $0xb0] sm:$0xff]  ;;  %v2230_v14 = vld [vmem:[%s2648_s26 + $0xa8] sm:$0xff] }
  0x1d   : > { %v2232_v12 = vld [vmem:[%s2648_s26 + $0xc0] sm:$0xff]  ;;  %v2708_v15 = vld [vmem:[%s2648_s26 + $0x9] sm:$0xff]  ;;  %v2720_v18 = vld [vmem:[%s2648_s26 + $0x31] sm:$0xff] }
  0x1e   : > { %v2711_v16 = vld [vmem:[%s2648_s26 + $0x1] sm:$0xff]  ;;  %v2726_v20 = vld [vmem:[%s2648_s26 + $0x19] sm:$0xff]  ;;  %v2735_v21 = vld [vmem:[%s2648_s26 + $0x51] sm:$0xff] }
  0x1f   : > { %v2233_v17 = vld [vmem:[%s2648_s26 + $0xc8] sm:$0xff]  ;;  %v2741_v23 = vld [vmem:[%s2648_s26 + $0x39] sm:$0xff]  ;;  %v2768_v28 = vld [vmem:[%s2648_s26 + $0x91] sm:$0xff] }
  0x20   : > { %v2723_v19 = vld [vmem:[%s2648_s26 + $0x21] sm:$0xff]  ;;  %v2738_v22 = vld [vmem:[%s2648_s26 + $0x49] sm:$0xff]  ;;  %v2750_v24 = vld [vmem:[%s2648_s26 + $0x79] sm:$0xff] }
  0x21   : > { %302 = vrot.lane.b32.xlu2 %v2666_v3, %s2585_s27  ;;  %298 = vrot.lane.b32.xlu1 %v2669_v4, %s2585_s27  ;;  %v2753_v25 = vld [vmem:[%s2648_s26 + $0x69] sm:$0xff]  ;;  %v2756_v26 = vld [vmem:[%s2648_s26 + $0x61] sm:$0xff] }
  0x22   : > { %294 = vrot.lane.b32.xlu0 %v2219_v5, %s2585_s27  ;;  %v2765_v27 = vld [vmem:[%s2648_s26 + $0x99] sm:$0xff]  ;;  %v2771_v29 = vld [vmem:[%s2648_s26 + $0x81] sm:$0xff]  ;;  %v2781_v31 = vld [vmem:[%s2648_s26 + $0xb1] sm:$0xff] }
  0x23   : > { %v260_v30 = vld [vmem:[%s2648_s26] sm:$0xff]  ;;  %v2784_v32 = vld [vmem:[%s2648_s26 + $0xa9] sm:$0xff] }
  0x24   : > { %v261_v33 = vld [vmem:[%s2648_s26 + $0x8] sm:$0xff] }
  0x25   : > { %v2885_v57 = vld [vmem:[%s2648_s26 + $0xc1] sm:$0xff]  ;;  %v687_v61 = vld [vmem:[%s2648_s26 + $0xa] sm:$0xff] }
  0x26   : > { %v686_v62 = vld [vmem:[%s2648_s26 + $0x2] sm:$0xff]  ;;  %v2961_v46 = vld [vmem:[%s2648_s26 + $0x6a] sm:$0xff] }
  0x27   : > { %v2902_v63 = vld [vmem:[%s2648_s26 + $0xc9] sm:$0xff]  ;;  %4027 = vst [vmem:[#allocation5_spill] sm:$0xff] %v2961_v46 }
  0x28   : > { %v2964_v50 = vld [vmem:[%s2648_s26 + $0x62] sm:$0xff] }
  0x29   : > { %308 = vrot.lane.b32.xlu2 %v2678_v6, %s2585_s27  ;;  %306 = vrot.lane.b32.xlu1 %v2681_v7, %s2585_s27  ;;  %4028 = vst [vmem:[#allocation6_spill] sm:$0xff] %v2964_v50 }
  0x2a   : > { %304 = vrot.lane.b32.xlu0 %v2684_v8, %s2585_s27 }
  0x31   : > { %314 = vrot.lane.b32.xlu2 %v2693_v9, %s2585_s27  ;;  %312 = vrot.lane.b32.xlu1 %v2228_v10, %s2585_s27 }
  0x32   : > { %310 = vrot.lane.b32.xlu0 %v2227_v11, %s2585_s27 }
  0x39   : > { %320 = vrot.lane.b32.xlu2 %v2232_v12, %s2585_s27  ;;  %318 = vrot.lane.b32.xlu1 %v2231_v13, %s2585_s27  ;;  %v2937_v12 = vld [vmem:[%s2648_s26 + $0x52] sm:$0xff] }
  0x3a   : > { %316 = vrot.lane.b32.xlu0 %v2230_v14, %s2585_s27  ;;  %4024 = vst [vmem:[#allocation2_spill] sm:$0xff] %v2937_v12 }
  0x41   : > { %358 = vrot.lane.b32.xlu2 %v2708_v15, %s2586_s28  ;;  %356 = vrot.lane.b32.xlu1 %v2711_v16, %s2586_s28 }
  0x42   : > { %322 = vrot.lane.b32.xlu0 %v2233_v17, %s2585_s27 }
  0x49   : > { %364 = vrot.lane.b32.xlu2 %v2720_v18, %s2586_s28  ;;  %362 = vrot.lane.b32.xlu1 %v2723_v19, %s2586_s28 }
  0x4a   : > { %360 = vrot.lane.b32.xlu0 %v2726_v20, %s2586_s28 }
  0x51   : > { %370 = vrot.lane.b32.xlu2 %v2735_v21, %s2586_s28  ;;  %368 = vrot.lane.b32.xlu1 %v2738_v22, %s2586_s28 }
  0x52   : > { %366 = vrot.lane.b32.xlu0 %v2741_v23, %s2586_s28 }
  0x59   : > { %376 = vrot.lane.b32.xlu2 %v2750_v24, %s2586_s28  ;;  %374 = vrot.lane.b32.xlu1 %v2753_v25, %s2586_s28 }
  0x5a   : > { %372 = vrot.lane.b32.xlu0 %v2756_v26, %s2586_s28 }
  0x61   : > { %382 = vrot.lane.b32.xlu2 %v2765_v27, %s2586_s28  ;;  %380 = vrot.lane.b32.xlu1 %v2768_v28, %s2586_s28 }
  0x62   : > { %378 = vrot.lane.b32.xlu0 %v2771_v29, %s2586_s28 }
  0x69   : > { %420 = vrot.lane.b32.xlu2 %v260_v30, %s2587_s29  ;;  %386 = vrot.lane.b32.xlu1 %v2781_v31, %s2586_s28 }
  0x6a   : > { %384 = vrot.lane.b32.xlu0 %v2784_v32, %s2586_s28 }
  0x71   : > { %426 = vrot.lane.b32.xlu2 %v2219_v5, %s2587_s29  ;;  %424 = vrot.lane.b32.xlu1 %v2657_v2, %s2587_s29 }
  0x72   : > { %422 = vrot.lane.b32.xlu0 %v261_v33, %s2587_s29 }
  0x73   : > { %v2796_v34 = vpop.permute.xlu2 %300 }
  0x79   : > { %432 = vrot.lane.b32.xlu2 %v2651_v0, %s2587_s29  ;;  %430 = vrot.lane.b32.xlu1 %v2669_v4, %s2587_s29 }
  0x7a   : > { %428 = vrot.lane.b32.xlu0 %v2654_v1, %s2587_s29 }
  0x7b   : > { %v2804_v35 = vpop.permute.xlu2 %302 }
  0x81   : > { %438 = vrot.lane.b32.xlu2 %v2681_v7, %s2587_s29  ;;  %436 = vrot.lane.b32.xlu1 %v2684_v8, %s2587_s29  ;;  %v2921_v7 = vld [vmem:[%s2648_s26 + $0x22] sm:$0xff]  ;;  %v2924_v8 = vld [vmem:[%s2648_s26 + $0x1a] sm:$0xff] }
  0x82   : > { %434 = vrot.lane.b32.xlu0 %v2666_v3, %s2587_s29 }
  0x83   : > { %v2812_v36 = vpop.permute.xlu2 %308 }
  0x89   : > { %444 = vrot.lane.b32.xlu2 %v2228_v10, %s2587_s29  ;;  %442 = vrot.lane.b32.xlu1 %v2227_v11, %s2587_s29 }
  0x8a   : > { %440 = vrot.lane.b32.xlu0 %v2678_v6, %s2587_s29  ;;  %v2918_v6 = vld [vmem:[%s2648_s26 + $0x32] sm:$0xff] }
  0x8b   : > { %v2818_v37 = vpop.permute.xlu2 %314  ;;  %v2820_v38 = vpop.permute.xlu1 %296 }
  0x8c   : > { %v293_v39 = vpop.permute.xlu0 %292 }
  0x8d   : > { %v469_v0 = vsel %vm468_vm0, %v2726_v20, %v293_v39  ;;  %v2958_v39 = vld [vmem:[%s2648_s26 + $0x7a] sm:$0xff] }
  0x8e   : > { %4026 = vst [vmem:[#allocation4_spill] sm:$0xff] %v2958_v39 }
  0x91   : > { %450 = vrot.lane.b32.xlu2 %v2231_v13, %s2587_s29  ;;  %448 = vrot.lane.b32.xlu1 %v2230_v14, %s2587_s29  ;;  %v2940_v13 = vld [vmem:[%s2648_s26 + $0x4a] sm:$0xff]  ;;  %v2943_v14 = vld [vmem:[%s2648_s26 + $0x3a] sm:$0xff] }
  0x92   : > { %446 = vrot.lane.b32.xlu0 %v2693_v9, %s2587_s29  ;;  %4025 = vst [vmem:[#allocation3_spill] sm:$0xff] %v2940_v13 }
  0x93   : > { %v2826_v40 = vpop.permute.xlu2 %320  ;;  %v2828_v41 = vpop.permute.xlu1 %298 }
  0x94   : > { %v2830_v42 = vpop.permute.xlu0 %294 }
  0x99   : > { %738 = vrot.lane.b32.xlu2 %v2720_v18, %s2585_s27  ;;  %736 = vrot.lane.b32.xlu1 %v2723_v19, %s2585_s27 }
  0x9a   : > { %734 = vrot.lane.b32.xlu0 %v2726_v20, %s2585_s27 }
  0x9b   : > { %v2838_v43 = vpop.permute.xlu2 %358  ;;  %v2840_v44 = vpop.permute.xlu1 %306 }
  0x9c   : > { %v2842_v45 = vpop.permute.xlu0 %304 }
  0xa1   : > { %744 = vrot.lane.b32.xlu2 %v2735_v21, %s2585_s27  ;;  %742 = vrot.lane.b32.xlu1 %v2738_v22, %s2585_s27 }
  0xa2   : > { %740 = vrot.lane.b32.xlu0 %v2741_v23, %s2585_s27 }
  0xa3   : > { %v2853_v47 = vpop.permute.xlu2 %364  ;;  %v2855_v48 = vpop.permute.xlu1 %312 }
  0xa4   : > { %v2857_v49 = vpop.permute.xlu0 %310 }
  0xa9   : > { %750 = vrot.lane.b32.xlu2 %v2750_v24, %s2585_s27  ;;  %748 = vrot.lane.b32.xlu1 %v2753_v25, %s2585_s27 }
  0xaa   : > { %746 = vrot.lane.b32.xlu0 %v2756_v26, %s2585_s27 }
  0xab   : > { %v2868_v51 = vpop.permute.xlu2 %370  ;;  %v2870_v52 = vpop.permute.xlu1 %318 }
  0xac   : > { %v2872_v53 = vpop.permute.xlu0 %316 }
  0xb1   : > { %756 = vrot.lane.b32.xlu2 %v2765_v27, %s2585_s27  ;;  %754 = vrot.lane.b32.xlu1 %v2768_v28, %s2585_s27 }
  0xb2   : > { %752 = vrot.lane.b32.xlu0 %v2771_v29, %s2585_s27 }
  0xb3   : > { %v2880_v54 = vpop.permute.xlu2 %376  ;;  %v357_v55 = vpop.permute.xlu1 %356 }
  0xb4   : > { %v2882_v56 = vpop.permute.xlu0 %322  ;;  %v486_v1 = vsel %vm485_vm2, %v469_v0, %v357_v55  ;;  %v2979_v0 = vld [vmem:[%s2648_s26 + $0x9a] sm:$0xff] }
  0xb5   : > { %4029 = vst [vmem:[#allocation7_spill] sm:$0xff] %v2979_v0 }
  0xb9   : > { %762 = vrot.lane.b32.xlu2 %v2885_v57, %s2585_s27  ;;  %760 = vrot.lane.b32.xlu1 %v2781_v31, %s2585_s27 }
  0xba   : > { %758 = vrot.lane.b32.xlu0 %v2784_v32, %s2585_s27 }
  0xbb   : > { %v2893_v58 = vpop.permute.xlu2 %382  ;;  %v2895_v59 = vpop.permute.xlu1 %362 }
  0xbc   : > { %v2897_v60 = vpop.permute.xlu0 %360 }
  0xc1   : > { %800 = vrot.lane.b32.xlu2 %v687_v61, %s2586_s28  ;;  %798 = vrot.lane.b32.xlu1 %v686_v62, %s2586_s28 }
  0xc2   : > { %764 = vrot.lane.b32.xlu0 %v2902_v63, %s2585_s27 }
  0xc3   : > { %v421_v2 = vpop.permute.xlu2 %420  ;;  %v2911_v3 = vpop.permute.xlu1 %368 }
  0xc4   : > { %v2913_v4 = vpop.permute.xlu0 %366  ;;  %v503_v5 = vsel %vm502_vm1, %v486_v1, %v421_v2  ;;  %v2982_v1 = vld [vmem:[%s2648_s26 + $0x92] sm:$0xff]  ;;  %v2985_v2 = vld [vmem:[%s2648_s26 + $0x82] sm:$0xff] }
  0xc5   : > { %2234 = vmatmul.msk.f32.vlgmr.msra.gmra.mxu0 %vm524_vm3, %v503_v5  ;;  %4030 = vst [vmem:[#allocation8_spill] sm:$0xff] %v2982_v1  ;;  %v470_v5 = vsel %vm468_vm0, %v2723_v19, %v2830_v42  ;;  %v471_v42 = vsel %vm468_vm0, %v2720_v18, %v2820_v38 }
  0xc9   : > { %806 = vrot.lane.b32.xlu2 %v2918_v6, %s2586_s28  ;;  %804 = vrot.lane.b32.xlu1 %v2921_v7, %s2586_s28 }
  0xca   : > { %802 = vrot.lane.b32.xlu0 %v2924_v8, %s2586_s28 }
  0xcb   : > { %v427_v9 = vpop.permute.xlu2 %426  ;;  %v2932_v10 = vpop.permute.xlu1 %374 }
  0xcc   : > { %v2934_v11 = vpop.permute.xlu0 %372 }
  0xd1   : > { %812 = vrot.lane.b32.xlu2 %v2937_v12, %s2586_s28  ;;  %810 = vrot.lane.b32.xlu1 %v2940_v13, %s2586_s28 }
  0xd2   : > { %808 = vrot.lane.b32.xlu0 %v2943_v14, %s2586_s28 }
  0xd3   : > { %v2951_v17 = vpop.permute.xlu2 %432  ;;  %v2953_v30 = vpop.permute.xlu1 %380 }
  0xd4   : > { %v2955_v33 = vpop.permute.xlu0 %378 }
  0xd9   : > { %818 = vrot.lane.b32.xlu2 %v2958_v39, %s2586_s28  ;;  %816 = vrot.lane.b32.xlu1 %v2961_v46, %s2586_s28 }
  0xda   : > { %814 = vrot.lane.b32.xlu0 %v2964_v50, %s2586_s28  ;;  %v487_v50 = vsel %vm485_vm2, %v470_v5, %v2838_v43 }
  0xdb   : > { %v2972_v55 = vpop.permute.xlu2 %438  ;;  %v2974_v61 = vpop.permute.xlu1 %386 }
  0xdc   : > { %v2976_v62 = vpop.permute.xlu0 %384 }
  0xe1   : > { %824 = vrot.lane.b32.xlu2 %v2979_v0, %s2586_s28  ;;  %822 = vrot.lane.b32.xlu1 %v2982_v1, %s2586_s28  ;;  %v3003_v0 = vld [vmem:[%s2648_s26 + $0xb2] sm:$0xff]  ;;  %v3006_v1 = vld [vmem:[%s2648_s26 + $0xaa] sm:$0xff] }
  0xe2   : > { %820 = vrot.lane.b32.xlu0 %v2985_v2, %s2586_s28 }
  0xe3   : > { %v2996_v39 = vpop.permute.xlu2 %444  ;;  %v425_v46 = vpop.permute.xlu1 %424 }
  0xe4   : > { %v423_v12 = vpop.permute.xlu0 %422 }
  0xe5   : > { %v504_v13 = vsel %vm502_vm1, %v487_v50, %v423_v12 }
  0xe6   : > { %2235 = vmatmul.msk.f32.gmra.mxu0 %vm524_vm3, %v504_v13  ;;  %v488_v13 = vsel %vm485_vm2, %v471_v42, %v2897_v60 }
  0xe7   : > { %v505_v5 = vsel %vm502_vm1, %v488_v13, %v425_v46 }
  0xe9   : > { %862 = vrot.lane.b32.xlu2 %v2711_v16, %s2587_s29  ;;  %828 = vrot.lane.b32.xlu1 %v3003_v0, %s2586_s28  ;;  %v472_v16 = vsel %vm468_vm0, %v2741_v23, %v2828_v41 }
  0xea   : > { %826 = vrot.lane.b32.xlu0 %v3006_v1, %s2586_s28  ;;  %v489_v46 = vsel %vm485_vm2, %v472_v16, %v2895_v59 }
  0xeb   : > { %v3017_v43 = vpop.permute.xlu2 %450  ;;  %v431_v12 = vpop.permute.xlu1 %430  ;;  %v506_v13 = vsel %vm502_vm1, %v489_v46, %v427_v9 }
  0xec   : > { %v429_v50 = vpop.permute.xlu0 %428 }
  0xee   : > { %2236 = vmatmul.msk.f32.gmra.mxu0 %vm524_vm3, %v505_v5 }
  0xf1   : > { %868 = vrot.lane.b32.xlu2 %v2723_v19, %s2587_s29  ;;  %866 = vrot.lane.b32.xlu1 %v2726_v20, %s2587_s29 }
  0xf2   : > { %864 = vrot.lane.b32.xlu0 %v2708_v15, %s2587_s29  ;;  %v473_v15 = vsel %vm468_vm0, %v2738_v22, %v2796_v34  ;;  %v474_v34 = vsel %vm468_vm0, %v2735_v21, %v2804_v35  ;;  %v475_v35 = vsel %vm468_vm0, %v2756_v26, %v2842_v45  ;;  %v476_v45 = vsel %vm468_vm0, %v2753_v25, %v2840_v44 }
  0xf3   : > { %v3032_v38 = vpop.permute.xlu2 %738  ;;  %v437_v60 = vpop.permute.xlu1 %436  ;;  %v490_v9 = vsel %vm485_vm2, %v473_v15, %v2853_v47 }
  0xf4   : > { %v435_v42 = vpop.permute.xlu0 %434  ;;  %v507_v16 = vsel %vm502_vm1, %v490_v9, %v429_v50  ;;  %v491_v50 = vsel %vm485_vm2, %v474_v34, %v2913_v4 }
  0xf5   : > { %v508_v15 = vsel %vm502_vm1, %v491_v50, %v431_v12  ;;  %v492_v12 = vsel %vm485_vm2, %v475_v35, %v2911_v3 }
  0xf6   : > { %2237 = vmatmul.msk.f32.gmra.mxu0 %vm524_vm3, %v506_v13  ;;  %v509_v34 = vsel %vm502_vm1, %v492_v12, %v2951_v17  ;;  %v493_v17 = vsel %vm485_vm2, %v476_v45, %v2868_v51 }
  0xf7   : > { %v510_v35 = vsel %vm502_vm1, %v493_v17, %v435_v42 }
  0xf9   : > { %874 = vrot.lane.b32.xlu2 %v2738_v22, %s2587_s29  ;;  %872 = vrot.lane.b32.xlu1 %v2741_v23, %s2587_s29 }
  0xfa   : > { %870 = vrot.lane.b32.xlu0 %v2720_v18, %s2587_s29 }
  0xfb   : > { %v3047_v41 = vpop.permute.xlu2 %744  ;;  %v3049_v59 = vpop.permute.xlu1 %442 }
  0xfc   : > { %v441_v5 = vpop.permute.xlu0 %440 }
  0xfe   : > { %2238 = vmatmul.msk.f32.gmra.mxu0 %vm524_vm3, %v507_v16 }
 0x101   : > { %880 = vrot.lane.b32.xlu2 %v2753_v25, %s2587_s29  ;;  %878 = vrot.lane.b32.xlu1 %v2756_v26, %s2587_s29  ;;  %v477_v25 = vsel %vm468_vm0, %v2750_v24, %v2812_v36 }
 0x102   : > { %876 = vrot.lane.b32.xlu0 %v2735_v21, %s2587_s29  ;;  %v494_v51 = vsel %vm485_vm2, %v477_v25, %v2934_v11 }
 0x103   : > { %v3064_v46 = vpop.permute.xlu2 %750  ;;  %v3066_v47 = vpop.permute.xlu1 %448  ;;  %v511_v42 = vsel %vm502_vm1, %v494_v51, %v437_v60 }
 0x104   : > { %v3070_v13 = vpop.permute.xlu0 %446 }
 0x106   : > { %2239 = vmatmul.msk.f32.gmra.mxu0 %vm524_vm3, %v508_v15 }
 0x109   : > { %886 = vrot.lane.b32.xlu2 %v2768_v28, %s2587_s29  ;;  %884 = vrot.lane.b32.xlu1 %v2771_v29, %s2587_s29 }
 0x10a   : > { %882 = vrot.lane.b32.xlu0 %v2750_v24, %s2587_s29  ;;  %v478_v24 = vsel %vm468_vm0, %v2771_v29, %v2857_v49  ;;  %v479_v29 = vsel %vm468_vm0, %v2768_v28, %v2855_v48  ;;  %v480_v28 = vsel %vm468_vm0, %v2765_v27, %v2818_v37 }
 0x10b   : > { %v3083_v4 = vpop.permute.xlu2 %756  ;;  %v3085_v9 = vpop.permute.xlu1 %736  ;;  %v495_v60 = vsel %vm485_vm2, %v478_v24, %v2932_v10  ;;  %v496_v10 = vsel %vm485_vm2, %v479_v29, %v2880_v54 }
 0x10c   : > { %v3089_v16 = vpop.permute.xlu0 %734  ;;  %v512_v17 = vsel %vm502_vm1, %v495_v60, %v2972_v55  ;;  %v513_v51 = vsel %vm502_vm1, %v496_v10, %v441_v5  ;;  %v3190_v60 = vld [vmem:[%s4008_s2] ss:$0 sm:$0xff] }
 0x10e   : > { %2240 = vmatmul.msk.f32.gmra.mxu0 %vm524_vm3, %v509_v34 }
 0x111   : > { %892 = vrot.lane.b32.xlu2 %v2781_v31, %s2587_s29  ;;  %890 = vrot.lane.b32.xlu1 %v2784_v32, %s2587_s29 }
 0x112   : > { %888 = vrot.lane.b32.xlu0 %v2765_v27, %s2587_s29  ;;  %v481_v27 = vsel %vm468_vm0, %v2784_v32, %v2872_v53  ;;  %v910_v32 = vsel %vm468_vm0, %v2924_v8, %v3089_v16 }
 0x113   : > { %v3103_v3 = vpop.permute.xlu2 %762  ;;  %v3105_v50 = vpop.permute.xlu1 %742 }
 0x114   : > { %v3109_v15 = vpop.permute.xlu0 %740 }
 0x116   : > { %2241 = vmatmul.msk.f32.gmra.mxu0 %vm524_vm3, %v510_v35 }
 0x119   : > { %1673 = vrot.lane.b32.xlu2 %v2720_v18, %s2585_s27  ;;  %v2283_v18 = vld [vmem:[%s4007_s1 + $0x18] sm:$0xff] }
 0x11a   : > { %1023 = vmatpush.msra.mxu1 %v2283_v18 }
 0x11b   : > { %v3118_v44 = vpop.permute.xlu2 %800  ;;  %v3120_v12 = vpop.permute.xlu1 %748 }
 0x11c   : > { %v3124_v34 = vpop.permute.xlu0 %746 }
 0x11e   : > { %2242 = vmatmul.msk.f32.gmra.mxu0 %vm524_vm3, %v511_v42  ;;  %v497_v42 = vsel %vm485_vm2, %v480_v28, %v2955_v33  ;;  %v498_v33 = vsel %vm485_vm2, %v481_v27, %v2953_v30  ;;  %v482_v30 = vsel %vm468_vm0, %v2781_v31, %v2870_v52  ;;  %v483_v31 = vsel %vm468_vm0, %v2885_v57, %v2826_v40 }
 0x11f   : > { %v514_v54 = vsel %vm502_vm1, %v497_v42, %v3049_v59  ;;  %v515_v59 = vsel %vm502_vm1, %v498_v33, %v2996_v39  ;;  %v499_v16 = vsel %vm485_vm2, %v482_v30, %v2893_v58  ;;  %v500_v52 = vsel %vm485_vm2, %v483_v31, %v2976_v62  ;;  %v4031_v31 = vld [vmem:[#allocation3_spill] sm:$0xff] }
 0x120   : > { %v516_v28 = vsel %vm502_vm1, %v499_v16, %v3070_v13  ;;  %v517_v42 = vsel %vm502_vm1, %v500_v52, %v3066_v47  ;;  %v484_v13 = vsel %vm468_vm0, %v2902_v63, %v2882_v56  ;;  %v911_v56 = vsel %vm468_vm0, %v2921_v7, %v3085_v9 }
 0x121   : > { %1675 = vrot.lane.b32.xlu2 %v2741_v23, %s2585_s27  ;;  %v2282_v23 = vld [vmem:[%s4007_s1 + $0x10] sm:$0xff]  ;;  %v501_v40 = vsel %vm485_vm2, %v484_v13, %v2974_v61  ;;  %v927_v61 = vsel %vm485_vm2, %v911_v56, %v3118_v44  ;;  %v914_v52 = vsel %vm468_vm0, %v4031_v31, %v3105_v50 }
 0x122   : > { %1024 = vmatpush.msra.mxu1 %v2282_v23  ;;  %v518_v62 = vsel %vm502_vm1, %v501_v40, %v3017_v43 }
 0x123   : > { %v3136_v36 = vpop.permute.xlu2 %806  ;;  %v3138_v11 = vpop.permute.xlu1 %754 }
 0x124   : > { %v3142_v45 = vpop.permute.xlu0 %752 }
 0x126   : > { %2243 = vmatmul.msk.f32.gmra.mxu0 %vm524_vm3, %v512_v17 }
 0x12b   : > { %v3153_v49 = vpop.permute.xlu2 %812  ;;  %v3155_v35 = vpop.permute.xlu1 %760 }
 0x12c   : > { %v3159_v25 = vpop.permute.xlu0 %758 }
 0x12e   : > { %2244 = vmatmul.msk.f32.gmra.mxu0 %vm524_vm3, %v513_v51 }
 0x133   : > { %v3167_v48 = vpop.permute.xlu2 %818  ;;  %v799_v55 = vpop.permute.xlu1 %798 }
 0x134   : > { %v3171_v18 = vpop.permute.xlu0 %764  ;;  %v926_v39 = vsel %vm485_vm2, %v910_v32, %v799_v55 }
 0x136   : > { %2245 = vmatmul.msk.f32.gmra.mxu0 %vm524_vm3, %v514_v54 }
 0x13b   : > { %v3180_v37 = vpop.permute.xlu2 %824  ;;  %v805_v5 = vpop.permute.xlu1 %804 }
 0x13c   : > { %v803_v24 = vpop.permute.xlu0 %802 }
 0x13e   : > { %2246 = vmatmul.msk.f32.gmra.mxu0 %vm524_vm3, %v515_v59 }
 0x142   : > { %v590_v53 = vpop.f32.mrf.mxu0 }
 0x143   : > { %v591_v23 = vadd.f32 %v3190_v60, %v590_v53  ;;  %v863_v17 = vpop.permute.xlu2 %862  ;;  %v3205_v29 = vpop.permute.xlu1 %810  ;;  %v912_v53 = vsel %vm468_vm0, %v2918_v6, %v3032_v38 }
 0x144   : > { %v809_v10 = vpop.permute.xlu0 %808  ;;  %v942_v51 = vsel %vm502_vm1, %v926_v39, %v863_v17  ;;  %v928_v30 = vsel %vm485_vm2, %v912_v53, %v803_v24  ;;  %v913_v17 = vsel %vm468_vm0, %v2943_v14, %v3109_v15  ;;  %v930_v15 = vsel %vm485_vm2, %v914_v52, %v3136_v36 }
 0x145   : > { %638 = vst.msk [vmem:[%s3198_s25] sm:$0xff] %vm468_vm0, %v591_v23  ;;  %2284 = vmatmul.msk.f32.vlgmr.msra.gmra.mxu1 %vm524_vm3, %v942_v51  ;;  %v929_v38 = vsel %vm485_vm2, %v913_v17, %v805_v5  ;;  %v919_v52 = vsel %vm468_vm0, %v2985_v2, %v3142_v45 }
 0x146   : > { %2247 = vmatmul.msk.f32.gmra.mxu0 %vm524_vm3, %v516_v28 }
 0x14b   : > { %v3221_v58 = vpop.permute.xlu1 %816  ;;  %v869_v23 = vpop.permute.xlu2 %868 }
 0x14c   : > { %v3223_v55 = vpop.permute.xlu0 %814  ;;  %v945_v24 = vsel %vm502_vm1, %v929_v38, %v869_v23 }
 0x14e   : > { %2248 = vmatmul.msk.f32.gmra.mxu0 %vm524_vm3, %v517_v42 }
 0x153   : > { %v3237_v54 = vpop.permute.xlu1 %822 }
 0x154   : > { %v3233_v57 = vpop.permute.xlu0 %820 }
 0x156   : > { %2249 = vmatmul.msk.f32.gmra.mxu0 %vm524_vm3, %v518_v62  ;;  %v4032_v62 = vld [vmem:[#allocation2_spill] sm:$0xff] }
 0x157   : > { %v915_v56 = vsel %vm468_vm0, %v4032_v62, %v3047_v41 }
 0x158   : > { %v931_v50 = vsel %vm485_vm2, %v915_v56, %v809_v10 }
 0x15b   : > { %v3242_v27 = vpop.permute.xlu1 %828 }
 0x15c   : > { %v3240_v47 = vpop.permute.xlu0 %826 }
 0x163   : > { %v593_v63 = vpop.f32.mrf.mxu0  ;;  %v867_v32 = vpop.permute.xlu1 %866 }
 0x164   : > { %v594_v33 = vadd.f32 %v3190_v60, %v593_v63  ;;  %v865_v43 = vpop.permute.xlu0 %864  ;;  %v944_v39 = vsel %vm502_vm1, %v928_v30, %v867_v32  ;;  %v4034_v30 = vld [vmem:[#allocation5_spill] sm:$0xff] }
 0x165   : > { %v943_v59 = vsel %vm502_vm1, %v927_v61, %v865_v43  ;;  %v4033_v43 = vld [vmem:[#allocation6_spill] sm:$0xff] }
 0x166   : > { %639 = vst.msk [vmem:[%s3198_s25 + $0x8] sm:$0xff] %vm468_vm0, %v594_v33  ;;  %2285 = vmatmul.msk.f32.gmra.mxu1 %vm524_vm3, %v943_v59  ;;  %v875_v33 = vpop.permute.xlu2 %874  ;;  %v916_v59 = vsel %vm468_vm0, %v4033_v43, %v3124_v34 }
 0x167   : > { %v932_v41 = vsel %vm485_vm2, %v916_v59, %v3205_v29 }
 0x168   : > { %v948_v53 = vsel %vm502_vm1, %v932_v41, %v875_v33 }
 0x16b   : > { %v596_v9 = vpop.f32.mrf.mxu0  ;;  %v873_v40 = vpop.permute.xlu1 %872 }
 0x16c   : > { %v597_v44 = vadd.f32 %v3190_v60, %v596_v9  ;;  %v871_v28 = vpop.permute.xlu0 %870  ;;  %v947_v36 = vsel %vm502_vm1, %v931_v50, %v873_v40 }
 0x16d   : > { %v946_v13 = vsel %vm502_vm1, %v930_v15, %v871_v28 }
 0x16e   : > { %640 = vst.msk [vmem:[%s3198_s25 + $0x20] sm:$0xff] %vm468_vm0, %v597_v44  ;;  %2286 = vmatmul.msk.f32.gmra.mxu1 %vm524_vm3, %v944_v39  ;;  %v917_v44 = vsel %vm468_vm0, %v4034_v30, %v3120_v12  ;;  %v881_v28 = vpop.permute.xlu2 %880 }
 0x16f   : > { %v933_v34 = vsel %vm485_vm2, %v917_v44, %v3153_v49 }
 0x173   : > { %v599_v16 = vpop.f32.mrf.mxu0  ;;  %v879_v17 = vpop.permute.xlu1 %878 }
 0x174   : > { %v600_v51 = vadd.f32 %v3190_v60, %v599_v16  ;;  %v877_v9 = vpop.permute.xlu0 %876  ;;  %v4035_v16 = vld [vmem:[#allocation4_spill] sm:$0xff] }
 0x175   : > { %v949_v23 = vsel %vm502_vm1, %v933_v34, %v877_v9  ;;  %v918_v38 = vsel %vm468_vm0, %v4035_v16, %v3064_v46  ;;  %v935_v46 = vsel %vm485_vm2, %v919_v52, %v3221_v58 }
 0x176   : > { %641 = vst.msk [vmem:[%s3198_s25 + $0x28] sm:$0xff] %vm468_vm0, %v600_v51  ;;  %2287 = vmatmul.msk.f32.gmra.mxu1 %vm524_vm3, %v945_v24  ;;  %v934_v12 = vsel %vm485_vm2, %v918_v38, %v3223_v55  ;;  %v951_v15 = vsel %vm502_vm1, %v935_v46, %v881_v28  ;;  %v887_v41 = vpop.permute.xlu2 %886 }
 0x177   : > { %v950_v24 = vsel %vm502_vm1, %v934_v12, %v879_v17  ;;  %v3379_v17 = vld [vmem:[%s2648_s26 + $0xc2] sm:$0xff] }
 0x17b   : > { %v602_v42 = vpop.f32.mrf.mxu0  ;;  %v885_v50 = vpop.permute.xlu1 %884 }
 0x17c   : > { %v603_v5 = vadd.f32 %v3190_v60, %v602_v42 }
 0x17e   : > { %642 = vst.msk [vmem:[%s3198_s25 + $0x40] sm:$0xff] %vm468_vm0, %v603_v5  ;;  %2288 = vmatmul.msk.f32.gmra.mxu1 %vm524_vm3, %v946_v13  ;;  %v883_v5 = vpop.permute.xlu0 %882  ;;  %v4036_v13 = vld [vmem:[#allocation8_spill] sm:$0xff] }
 0x17f   : > { %v920_v40 = vsel %vm468_vm0, %v4036_v13, %v3138_v11 }
 0x180   : > { %v936_v56 = vsel %vm485_vm2, %v920_v40, %v3167_v48 }
 0x183   : > { %v605_v63 = vpop.f32.mrf.mxu0 }
 0x184   : > { %v606_v61 = vadd.f32 %v3190_v60, %v605_v63  ;;  %v952_v63 = vsel %vm502_vm1, %v936_v56, %v883_v5 }
 0x186   : > { %643 = vst.msk [vmem:[%s3198_s25 + $0x48] sm:$0xff] %vm468_vm0, %v606_v61  ;;  %2289 = vmatmul.msk.f32.gmra.mxu1 %vm524_vm3, %v947_v36  ;;  %v4037_v61 = vld [vmem:[#allocation7_spill] sm:$0xff]  ;;  %v889_v44 = vpop.permute.xlu0 %888 }
 0x187   : > { %v921_v36 = vsel %vm468_vm0, %v4037_v61, %v3083_v4  ;;  %v922_v4 = vsel %vm468_vm0, %v3006_v1, %v3159_v25  ;;  %v923_v1 = vsel %vm468_vm0, %v3003_v0, %v3155_v35  ;;  %v891_v0 = vpop.permute.xlu1 %890  ;;  %v924_v35 = vsel %vm468_vm0, %v3379_v17, %v3103_v3 }
 0x188   : > { %v937_v11 = vsel %vm485_vm2, %v921_v36, %v3233_v57  ;;  %v940_v38 = vsel %vm485_vm2, %v924_v35, %v3240_v47  ;;  %v2348_v36 = vld [vmem:[%s2648_s26 + $0x18] sm:$0xff]  ;;  %v2462_v35 = vld [vmem:[%s4007_s1 + $0x30] sm:$0xff] }
 0x189   : > { %v953_v59 = vsel %vm502_vm1, %v937_v11, %v885_v50  ;;  %v956_v12 = vsel %vm502_vm1, %v940_v38, %v891_v0  ;;  %v2463_v0 = vld [vmem:[%s4007_s1 + $0x38] sm:$0xff]  ;;  %v3501_v38 = vld [vmem:[%s2648_s26 + $0x61] sm:$0xff] }
 0x18a   : > { %1962 = vmatpush.msra.mxu3 %v2463_v0 }
 0x18b   : > { %v608_v32 = vpop.f32.mrf.mxu0 }
 0x18c   : > { %v609_v10 = vadd.f32 %v3190_v60, %v608_v32  ;;  %v3352_v32 = vld [vmem:[%s2648_s26 + $0x30] sm:$0xff]  ;;  %1963 = vmatpush.msra.mxu3 %v2462_v35 }
 0x18d   : > { %1236 = vrot.lane.b32.xlu1 %v3352_v32, %s2585_s27 }
 0x18e   : > { %644 = vst.msk [vmem:[%s3198_s25 + $0x60] sm:$0xff] %vm468_vm0, %v609_v10  ;;  %2290 = vmatmul.msk.f32.gmra.mxu1 %vm524_vm3, %v948_v53  ;;  %v938_v10 = vsel %vm485_vm2, %v922_v4, %v3237_v54  ;;  %v939_v54 = vsel %vm485_vm2, %v923_v1, %v3180_v37  ;;  %v3469_v4 = vld [vmem:[%s2648_s26 + $0x51] sm:$0xff] }
 0x18f   : > { %v954_v9 = vsel %vm502_vm1, %v938_v10, %v887_v41 }
 0x193   : > { %v611_v39 = vpop.f32.mrf.mxu0 }
 0x194   : > { %v612_v29 = vadd.f32 %v3190_v60, %v611_v39 }
 0x196   : > { %645 = vst.msk [vmem:[%s3198_s25 + $0x68] sm:$0xff] %vm468_vm0, %v612_v29  ;;  %2291 = vmatmul.msk.f32.gmra.mxu1 %vm524_vm3, %v949_v23  ;;  %v955_v23 = vsel %vm502_vm1, %v939_v54, %v889_v44 }
 0x19b   : > { %v614_v51 = vpop.f32.mrf.mxu0 }
 0x19c   : > { %v615_v49 = vadd.f32 %v3190_v60, %v614_v51 }
 0x19e   : > { %646 = vst.msk [vmem:[%s3198_s25 + $0x80] sm:$0xff] %vm468_vm0, %v615_v49  ;;  %2292 = vmatmul.msk.f32.gmra.mxu1 %vm524_vm3, %v950_v24  ;;  %v3394_v49 = vld [vmem:[%s2648_s26 + $0xca] sm:$0xff]  ;;  %v893_v24 = vpop.permute.xlu2 %892 }
 0x19f   : > { %v925_v3 = vsel %vm468_vm0, %v3394_v49, %v3171_v18 }
 0x1a0   : > { %v941_v47 = vsel %vm485_vm2, %v925_v3, %v3242_v27 }
 0x1a3   : > { %v617_v42 = vpop.f32.mrf.mxu0 }
 0x1a4   : > { %v618_v55 = vadd.f32 %v3190_v60, %v617_v42  ;;  %v957_v42 = vsel %vm502_vm1, %v941_v47, %v893_v24 }
 0x1a6   : > { %647 = vst.msk [vmem:[%s3198_s25 + $0x88] sm:$0xff] %vm468_vm0, %v618_v55  ;;  %2293 = vmatmul.msk.f32.gmra.mxu1 %vm524_vm3, %v951_v15  ;;  %v1674_v1 = vpop.permute.xlu2 %1673 }
 0x1ab   : > { %v620_v45 = vpop.f32.mrf.mxu0 }
 0x1ac   : > { %v621_v58 = vadd.f32 %v3190_v60, %v620_v45  ;;  %v3428_v45 = vld [vmem:[%s2648_s26 + $0x31] sm:$0xff] }
 0x1ae   : > { %648 = vst.msk [vmem:[%s3198_s25 + $0xa0] sm:$0xff] %vm468_vm0, %v621_v58  ;;  %2294 = vmatmul.msk.f32.gmra.mxu1 %vm524_vm3, %v952_v63  ;;  %v2332_v58 = vld [vmem:[%s2648_s26 + $0x19] sm:$0xff] }
 0x1b3   : > { %v623_v33 = vpop.f32.mrf.mxu0 }
 0x1b4   : > { %v624_v48 = vadd.f32 %v3190_v60, %v623_v33  ;;  %v3453_v33 = vld [vmem:[%s2648_s26 + $0x49] sm:$0xff] }
 0x1b6   : > { %649 = vst.msk [vmem:[%s3198_s25 + $0xa8] sm:$0xff] %vm468_vm0, %v624_v48  ;;  %2295 = vmatmul.msk.f32.gmra.mxu1 %vm524_vm3, %v953_v59  ;;  %v3461_v59 = vld [vmem:[%s2648_s26 + $0x69] sm:$0xff] }
 0x1bb   : > { %v626_v57 = vpop.f32.mrf.mxu0 }
 0x1bc   : > { %v627_v53 = vadd.f32 %v3190_v60, %v626_v57  ;;  %v2333_v57 = vld [vmem:[%s2648_s26 + $0x21] sm:$0xff] }
 0x1be   : > { %650 = vst.msk [vmem:[%s3198_s25 + $0xc0] sm:$0xff] %vm468_vm0, %v627_v53  ;;  %2296 = vmatmul.msk.f32.gmra.mxu1 %vm524_vm3, %v954_v9  ;;  %v2349_v9 = vld [vmem:[%s2648_s26 + $0x20] sm:$0xff] }
 0x1c2   : > { %v1026_v39 = vpop.f32.mrf.mxu1 }
 0x1c3   : > { %v629_v25 = vpop.f32.mrf.mxu0  ;;  %v1027_v34 = vadd.f32 %v3190_v60, %v1026_v39  ;;  %v2317_v39 = vld [vmem:[%s2648_s26 + $0x38] sm:$0xff] }
 0x1c4   : > { %v630_v29 = vadd.f32 %v3190_v60, %v629_v25 }
 0x1c5   : > { %1090 = vrot.lane.b32.xlu0 %v1027_v34, %s2585_s27 }
 0x1c6   : > { %651 = vst.msk [vmem:[%s3198_s25 + $0xc8] sm:$0xff] %vm468_vm0, %v630_v29  ;;  %2297 = vmatmul.msk.f32.gmra.mxu1 %vm524_vm3, %v955_v23  ;;  %v3487_v29 = vld [vmem:[%s2648_s26 + $0x79] sm:$0xff]  ;;  %v1676_v23 = vpop.permute.xlu2 %1675 }
 0x1cb   : > { %v632_v37 = vpop.f32.mrf.mxu0 }
 0x1cc   : > { %v633_v51 = vadd.f32 %v3190_v60, %v632_v37 }
 0x1cd   : > { %1737 = vrot.lane.b32.xlu0 %v2924_v8, %s2586_s28 }
 0x1ce   : > { %652 = vst.msk [vmem:[%s3198_s25 + $0xe0] sm:$0xff] %vm468_vm0, %v633_v51  ;;  %2298 = vmatmul.msk.f32.gmra.mxu1 %vm524_vm3, %v956_v12 }
 0x1d3   : > { %v635_v28 = vpop.f32.mrf.mxu0 }
 0x1d4   : > { %v636_v52 = vadd.f32 %v3190_v60, %v635_v28  ;;  %v2318_v28 = vld [vmem:[%s2648_s26 + $0x48] sm:$0xff] }
 0x1d5   : > { %1739 = vrot.lane.b32.xlu0 %v2921_v7, %s2586_s28 }
 0x1d6   : > { %653 = vst.msk [vmem:[%s3198_s25 + $0xe8] sm:$0xff] %vm468_vm0, %v636_v52  ;;  %2299 = vmatmul.msk.f32.gmra.mxu1 %vm524_vm3, %v957_v42 }
 0x1e3   : > { %v1029_v8 = vpop.f32.mrf.mxu1 }
 0x1e4   : > { %v1030_v46 = vadd.f32 %v3190_v60, %v1029_v8 }
 0x1e6   : > { %1092 = vrot.lane.b32.xlu1 %v1030_v46, %s2585_s27  ;;  %v3521_v46 = vld [vmem:[%s2648_s26 + $0x81] sm:$0xff] }
 0x1eb   : > { %v1032_v18 = vpop.f32.mrf.mxu1 }
 0x1ec   : > { %v1033_v27 = vadd.f32 %v3190_v60, %v1032_v18 }
 0x1ee   : > { %1094 = vrot.lane.b32.xlu2 %v1033_v27, %s2585_s27  ;;  %1801 = vrot.lane.b32.xlu1 %v2726_v20, %s2587_s29 }
 0x1f3   : > { %v1035_v55 = vpop.f32.mrf.mxu1 }
 0x1f4   : > { %v1036_v7 = vadd.f32 %v3190_v60, %v1035_v55  ;;  %v2319_v55 = vld [vmem:[%s2648_s26 + $0x50] sm:$0xff] }
 0x1f6   : > { %1096 = vrot.lane.b32.xlu0 %v1036_v7, %s2585_s27  ;;  %1677 = vrot.lane.b32.xlu2 %v2738_v22, %s2585_s27  ;;  %v3437_v22 = vld [vmem:[%s2648_s26 + $0x39] sm:$0xff]  ;;  %v1849_v7 = vsel %vm468_vm0, %v2918_v6, %v1674_v1 }
 0x1f7   : > { %1803 = vrot.lane.b32.xlu1 %v2723_v19, %s2587_s29 }
 0x1fb   : > { %v1038_v15 = vpop.f32.mrf.mxu1 }
 0x1fc   : > { %v1039_v5 = vadd.f32 %v3190_v60, %v1038_v15 }
 0x1fe   : > { %1741 = vrot.lane.b32.xlu0 %v2918_v6, %s2586_s28  ;;  %1679 = vrot.lane.b32.xlu2 %v2735_v21, %s2585_s27  ;;  %v3544_v6 = vld [vmem:[%s2648_s26 + $0x91] sm:$0xff] }
 0x1ff   : > { %1098 = vrot.lane.b32.xlu1 %v1039_v5, %s2585_s27  ;;  %v3516_v47 = vpop.permute.xlu1 %1236 }
 0x203   : > { %v1041_v20 = vpop.f32.mrf.mxu1 }
 0x204   : > { %v1042_v40 = vadd.f32 %v3190_v60, %v1041_v20 }
 0x206   : > { %1743 = vrot.lane.b32.xlu0 %v2943_v14, %s2586_s28  ;;  %1100 = vrot.lane.b32.xlu2 %v1042_v40, %s2585_s27 }
 0x207   : > { %1805 = vrot.lane.b32.xlu1 %v3428_v45, %s2587_s29 }
 0x20b   : > { %v1044_v19 = vpop.f32.mrf.mxu1 }
 0x20c   : > { %v1045_v21 = vadd.f32 %v3190_v60, %v1044_v19  ;;  %v1850_v19 = vsel %vm468_vm0, %v2943_v14, %v1676_v23  ;;  %v2320_v14 = vld [vmem:[%s2648_s26 + $0x60] sm:$0xff] }
 0x20e   : > { %1102 = vrot.lane.b32.xlu0 %v1045_v21, %s2585_s27  ;;  %1681 = vrot.lane.b32.xlu2 %v2756_v26, %s2585_s27 }
 0x20f   : > { %1807 = vrot.lane.b32.xlu1 %v3437_v22, %s2587_s29 }
 0x213   : > { %v1047_v56 = vpop.f32.mrf.mxu1 }
 0x214   : > { %v1048_v63 = vadd.f32 %v3190_v60, %v1047_v56 }
 0x216   : > { %1745 = vrot.lane.b32.xlu0 %v4031_v31, %s2586_s28  ;;  %1300 = vrot.lane.b32.xlu2 %v2332_v58, %s2586_s28 }
 0x217   : > { %1104 = vrot.lane.b32.xlu1 %v1048_v63, %s2585_s27 }
 0x21b   : > { %v1050_v50 = vpop.f32.mrf.mxu1 }
 0x21c   : > { %v1051_v26 = vadd.f32 %v3190_v60, %v1050_v50 }
 0x21e   : > { %1364 = vrot.lane.b32.xlu0 %v2348_v36, %s2587_s29  ;;  %1106 = vrot.lane.b32.xlu2 %v1051_v26, %s2585_s27 }
 0x21f   : > { %1809 = vrot.lane.b32.xlu1 %v3453_v33, %s2587_s29 }
 0x223   : > { %v1053_v11 = vpop.f32.mrf.mxu1 }
 0x224   : > { %v1054_v48 = vadd.f32 %v3190_v60, %v1053_v11 }
 0x226   : > { %1108 = vrot.lane.b32.xlu0 %v1054_v48, %s2585_s27  ;;  %1747 = vrot.lane.b32.xlu2 %v4032_v62, %s2586_s28  ;;  %v2364_v48 = vld [vmem:[%s4007_s1 + $0x20] sm:$0xff] }
 0x227   : > { %1683 = vrot.lane.b32.xlu1 %v3461_v59, %s2585_s27 }
 0x22b   : > { %v1056_v41 = vpop.f32.mrf.mxu1 }
 0x22c   : > { %v1057_v10 = vadd.f32 %v3190_v60, %v1056_v41  ;;  %v3573_v41 = vld [vmem:[%s2648_s26 + $0x99] sm:$0xff] }
 0x22e   : > { %1811 = vrot.lane.b32.xlu0 %v3469_v4, %s2587_s29  ;;  %1302 = vrot.lane.b32.xlu2 %v2333_v57, %s2586_s28 }
 0x22f   : > { %1110 = vrot.lane.b32.xlu1 %v1057_v10, %s2585_s27 }
 0x233   : > { %v1059_v53 = vpop.f32.mrf.mxu1 }
 0x234   : > { %v1060_v44 = vadd.f32 %v3190_v60, %v1059_v53 }
 0x236   : > { %1366 = vrot.lane.b32.xlu0 %v2349_v9, %s2587_s29  ;;  %1112 = vrot.lane.b32.xlu2 %v1060_v44, %s2585_s27 }
 0x237   : > { %1238 = vrot.lane.b32.xlu1 %v2317_v39, %s2585_s27  ;;  %v1091_v25 = vpop.permute.xlu0 %1090 }
 0x238   : > { %1139 = vst.msk [vmem:[%s3198_s25] sm:$0xff] %vm1138_vm4, %v1091_v25 }
 0x23b   : > { %v1062_v34 = vpop.f32.mrf.mxu1 }
 0x23c   : > { %v1063_v54 = vadd.f32 %v3190_v60, %v1062_v34 }
 0x23e   : > { %1114 = vrot.lane.b32.xlu0 %v1063_v54, %s2585_s27  ;;  %1749 = vrot.lane.b32.xlu2 %v4033_v43, %s2586_s28 }
 0x23f   : > { %1685 = vrot.lane.b32.xlu1 %v3487_v29, %s2585_s27  ;;  %v1738_v18 = vpop.permute.xlu0 %1737 }
 0x243   : > { %v1065_v37 = vpop.f32.mrf.mxu1 }
 0x244   : > { %v1066_v51 = vadd.f32 %v3190_v60, %v1065_v37 }
 0x246   : > { %1813 = vrot.lane.b32.xlu0 %v3501_v38, %s2587_s29  ;;  %1304 = vrot.lane.b32.xlu2 %v3428_v45, %s2586_s28 }
 0x247   : > { %1116 = vrot.lane.b32.xlu1 %v1066_v51, %s2585_s27  ;;  %v1740_v15 = vpop.permute.xlu0 %1739  ;;  %v2322_v51 = vld [vmem:[%s2648_s26 + $0x78] sm:$0xff] }
 0x248   : > { %v1095_v12 = vpop.permute.xlu2 %1094  ;;  %v1866_v58 = vsel %vm485_vm2, %v1850_v19, %v1740_v15  ;;  %v3656_v19 = vld [vmem:[%s2648_s26 + $0xc1] sm:$0xff] }
 0x249   : > { %1141 = vst.msk [vmem:[%s3198_s25 + $0x20] sm:$0xff] %vm1138_vm4, %v1095_v12 }
 0x24b   : > { %v1068_v24 = vpop.f32.mrf.mxu1 }
 0x24c   : > { %v1069_v3 = vadd.f32 %v3190_v60, %v1068_v24 }
 0x24e   : > { %1368 = vrot.lane.b32.xlu0 %v3352_v32, %s2587_s29  ;;  %1118 = vrot.lane.b32.xlu2 %v1069_v3, %s2585_s27 }
 0x24f   : > { %1240 = vrot.lane.b32.xlu1 %v2318_v28, %s2585_s27 }
 0x250   : > { %v1678_v52 = vpop.permute.xlu2 %1677 }
 0x251   : > { %v1851_v57 = vsel %vm468_vm0, %v4031_v31, %v1678_v52  ;;  %v2321_v31 = vld [vmem:[%s2648_s26 + $0x68] sm:$0xff] }
 0x253   : > { %v1071_v42 = vpop.f32.mrf.mxu1 }
 0x254   : > { %v1072_v8 = vadd.f32 %v3190_v60, %v1071_v42 }
 0x256   : > { %1120 = vrot.lane.b32.xlu0 %v1072_v8, %s2585_s27  ;;  %1751 = vrot.lane.b32.xlu2 %v4034_v30, %s2586_s28  ;;  %v1865_v30 = vsel %vm485_vm2, %v1849_v7, %v1738_v18  ;;  %v2403_v8 = vld [vmem:[%s2648_s26 + $0x6a] sm:$0xff]  ;;  %v2323_v7 = vld [vmem:[%s2648_s26 + $0x80] sm:$0xff] }
 0x257   : > { %1687 = vrot.lane.b32.xlu1 %v3521_v46, %s2585_s27 }
 0x258   : > { %v1680_v32 = vpop.permute.xlu2 %1679  ;;  %v1093_v27 = vpop.permute.xlu1 %1092 }
 0x259   : > { %1140 = vst.msk [vmem:[%s3198_s25 + $0x8] sm:$0xff] %vm1138_vm4, %v1093_v27 }
 0x25e   : > { %1815 = vrot.lane.b32.xlu0 %v3461_v59, %s2587_s29  ;;  %1306 = vrot.lane.b32.xlu2 %v3437_v22, %s2586_s28 }
 0x25f   : > { %1242 = vrot.lane.b32.xlu1 %v2319_v55, %s2585_s27 }
 0x260   : > { %v1802_v5 = vpop.permute.xlu1 %1801  ;;  %v1101_v20 = vpop.permute.xlu2 %1100 }
 0x261   : > { %1144 = vst.msk [vmem:[%s3198_s25 + $0x48] sm:$0xff] %vm1138_vm4, %v1101_v20  ;;  %v1881_v40 = vsel %vm502_vm1, %v1865_v30, %v1802_v5 }
 0x262   : > { %2464 = vmatmul.msk.f32.vlgmr.msra.gmra.mxu3 %vm524_vm3, %v1881_v40  ;;  %v3653_v40 = vld [vmem:[%s2648_s26 + $0xaa] sm:$0xff] }
 0x266   : > { %1370 = vrot.lane.b32.xlu0 %v2317_v39, %s2587_s29  ;;  %1753 = vrot.lane.b32.xlu2 %v4035_v16, %s2586_s28  ;;  %v2365_v16 = vld [vmem:[%s4007_s1 + $0x28] sm:$0xff] }
 0x267   : > { %1689 = vrot.lane.b32.xlu1 %v3544_v6, %s2585_s27  ;;  %1525 = vmatpush.msra.mxu2 %v2365_v16  ;;  %v2324_v16 = vld [vmem:[%s2648_s26 + $0x90] sm:$0xff] }
 0x268   : > { %v1682_v21 = vpop.permute.xlu2 %1681  ;;  %v1097_v56 = vpop.permute.xlu0 %1096 }
 0x269   : > { %v1804_v63 = vpop.permute.xlu1 %1803  ;;  %1142 = vst.msk [vmem:[%s3198_s25 + $0x28] sm:$0xff] %vm1138_vm4, %v1097_v56  ;;  %1526 = vmatpush.msra.mxu2 %v2364_v48  ;;  %v1853_v12 = vsel %vm468_vm0, %v4033_v43, %v1682_v21 }
 0x26a   : > { %v1882_v50 = vsel %vm502_vm1, %v1866_v58, %v1804_v63 }
 0x26b   : > { %2465 = vmatmul.msk.f32.gmra.mxu3 %vm524_vm3, %v1882_v50 }
 0x26e   : > { %1817 = vrot.lane.b32.xlu0 %v3487_v29, %s2587_s29  ;;  %1308 = vrot.lane.b32.xlu2 %v3453_v33, %s2586_s28 }
 0x26f   : > { %1244 = vrot.lane.b32.xlu1 %v2320_v14, %s2585_s27 }
 0x270   : > { %v1301_v36 = vpop.permute.xlu2 %1300  ;;  %v1742_v26 = vpop.permute.xlu0 %1741 }
 0x271   : > { %v1099_v11 = vpop.permute.xlu1 %1098  ;;  %v1867_v9 = vsel %vm485_vm2, %v1851_v57, %v1742_v26  ;;  %v3681_v57 = vld [vmem:[%s2648_s26 + $0xb2] sm:$0xff] }
 0x272   : > { %1143 = vst.msk [vmem:[%s3198_s25 + $0x40] sm:$0xff] %vm1138_vm4, %v1099_v11 }
 0x276   : > { %1372 = vrot.lane.b32.xlu0 %v2318_v28, %s2587_s29  ;;  %1755 = vrot.lane.b32.xlu2 %v2985_v2, %s2586_s28  ;;  %v1852_v2 = vsel %vm468_vm0, %v4032_v62, %v1680_v32  ;;  %v3601_v62 = vld [vmem:[%s2648_s26 + $0xa9] sm:$0xff] }
 0x277   : > { %1691 = vrot.lane.b32.xlu1 %v3573_v41, %s2585_s27 }
 0x278   : > { %v1107_v10 = vpop.permute.xlu2 %1106  ;;  %v1744_v53 = vpop.permute.xlu0 %1743 }
 0x279   : > { %v1806_v44 = vpop.permute.xlu1 %1805  ;;  %1147 = vst.msk [vmem:[%s3198_s25 + $0x80] sm:$0xff] %vm1138_vm4, %v1107_v10  ;;  %v1868_v34 = vsel %vm485_vm2, %v1852_v2, %v1744_v53  ;;  %v3684_v10 = vld [vmem:[%s2648_s26 + $0xc9] sm:$0xff]  ;;  %v2325_v2 = vld [vmem:[%s2648_s26 + $0x98] sm:$0xff] }
 0x27a   : > { %v1883_v39 = vsel %vm502_vm1, %v1867_v9, %v1806_v44 }
 0x27b   : > { %2466 = vmatmul.msk.f32.gmra.mxu3 %vm524_vm3, %v1883_v39 }
 0x27e   : > { %1819 = vrot.lane.b32.xlu0 %v3521_v46, %s2587_s29  ;;  %1310 = vrot.lane.b32.xlu2 %v3469_v4, %s2586_s28 }
 0x27f   : > { %1246 = vrot.lane.b32.xlu1 %v2321_v31, %s2585_s27 }
 0x280   : > { %v1748_v1 = vpop.permute.xlu2 %1747  ;;  %v1103_v25 = vpop.permute.xlu0 %1102 }
 0x281   : > { %v1808_v54 = vpop.permute.xlu1 %1807  ;;  %1145 = vst.msk [vmem:[%s3198_s25 + $0x60] sm:$0xff] %vm1138_vm4, %v1103_v25 }
 0x282   : > { %v1884_v23 = vsel %vm502_vm1, %v1868_v34, %v1808_v54 }
 0x283   : > { %2467 = vmatmul.msk.f32.gmra.mxu3 %vm524_vm3, %v1884_v23 }
 0x286   : > { %1374 = vrot.lane.b32.xlu0 %v2319_v55, %s2587_s29  ;;  %1757 = vrot.lane.b32.xlu2 %v4036_v13, %s2586_s28  ;;  %v1412_v13 = vsel %vm468_vm0, %v3428_v45, %v3516_v47  ;;  %v3630_v47 = vld [vmem:[%s2648_s26 + $0xb1] sm:$0xff] }
 0x287   : > { %1693 = vrot.lane.b32.xlu1 %v3601_v62, %s2585_s27  ;;  %v1428_v24 = vsel %vm485_vm2, %v1412_v13, %v1301_v36  ;;  %v2404_v36 = vld [vmem:[%s2648_s26 + $0x7a] sm:$0xff] }
 0x288   : > { %v1303_v0 = vpop.permute.xlu2 %1302  ;;  %v1746_v35 = vpop.permute.xlu0 %1745 }
 0x289   : > { %v1105_v37 = vpop.permute.xlu1 %1104  ;;  %v1869_v43 = vsel %vm485_vm2, %v1853_v12, %v1746_v35  ;;  %v3707_v35 = vld [vmem:[%s2648_s26 + $0xd9] sm:$0xff] }
 0x28a   : > { %1146 = vst.msk [vmem:[%s3198_s25 + $0x68] sm:$0xff] %vm1138_vm4, %v1105_v37 }
 0x28e   : > { %1821 = vrot.lane.b32.xlu0 %v3544_v6, %s2587_s29  ;;  %1312 = vrot.lane.b32.xlu2 %v3501_v38, %s2586_s28 }
 0x28f   : > { %1248 = vrot.lane.b32.xlu1 %v2322_v51, %s2585_s27 }
 0x290   : > { %v1113_v3 = vpop.permute.xlu2 %1112  ;;  %v1365_v28 = vpop.permute.xlu0 %1364 }
 0x291   : > { %v1810_v52 = vpop.permute.xlu1 %1809  ;;  %1150 = vst.msk [vmem:[%s3198_s25 + $0xa8] sm:$0xff] %vm1138_vm4, %v1113_v3  ;;  %v1444_v42 = vsel %vm502_vm1, %v1428_v24, %v1365_v28  ;;  %v2326_v24 = vld [vmem:[%s2648_s26 + $0xa8] sm:$0xff] }
 0x292   : > { %2366 = vmatmul.msk.f32.vlgmr.msra.gmra.mxu2 %vm524_vm3, %v1444_v42  ;;  %v1885_v45 = vsel %vm502_vm1, %v1869_v43, %v1810_v52 }
 0x293   : > { %2468 = vmatmul.msk.f32.gmra.mxu3 %vm524_vm3, %v1885_v45  ;;  %v3731_v45 = vld [vmem:[%s2648_s26 + $0xe1] sm:$0xff] }
 0x296   : > { %1376 = vrot.lane.b32.xlu0 %v2320_v14, %s2587_s29  ;;  %1759 = vrot.lane.b32.xlu2 %v4037_v61, %s2586_s28 }
 0x297   : > { %1695 = vrot.lane.b32.xlu1 %v3630_v47, %s2585_s27 }
 0x298   : > { %v1750_v18 = vpop.permute.xlu2 %1749  ;;  %v1109_v32 = vpop.permute.xlu0 %1108 }
 0x299   : > { %v1684_v27 = vpop.permute.xlu1 %1683  ;;  %1148 = vst.msk [vmem:[%s3198_s25 + $0x88] sm:$0xff] %vm1138_vm4, %v1109_v32  ;;  %v2406_v32 = vld [vmem:[%s2648_s26 + $0x92] sm:$0xff] }
 0x29a   : > { %v1854_v55 = vsel %vm468_vm0, %v2403_v8, %v1684_v27 }
 0x29b   : > { %v1870_v61 = vsel %vm485_vm2, %v1854_v55, %v1748_v1 }
 0x29e   : > { %1823 = vrot.lane.b32.xlu0 %v3573_v41, %s2587_s29  ;;  %1314 = vrot.lane.b32.xlu2 %v3461_v59, %s2586_s28 }
 0x29f   : > { %1250 = vrot.lane.b32.xlu1 %v2323_v7, %s2585_s27 }
 0x2a0   : > { %v1305_v15 = vpop.permute.xlu2 %1304  ;;  %v1812_v30 = vpop.permute.xlu0 %1811 }
 0x2a1   : > { %v1111_v5 = vpop.permute.xlu1 %1110  ;;  %v1886_v20 = vsel %vm502_vm1, %v1870_v61, %v1812_v30  ;;  %v2327_v61 = vld [vmem:[%s2648_s26 + $0xb0] sm:$0xff] }
 0x2a2   : > { %1149 = vst.msk [vmem:[%s3198_s25 + $0xa0] sm:$0xff] %vm1138_vm4, %v1111_v5  ;;  %2469 = vmatmul.msk.f32.gmra.mxu3 %vm524_vm3, %v1886_v20 }
 0x2a6   : > { %1378 = vrot.lane.b32.xlu0 %v2321_v31, %s2587_s29  ;;  %1761 = vrot.lane.b32.xlu2 %v3653_v40, %s2586_s28 }
 0x2a7   : > { %1697 = vrot.lane.b32.xlu1 %v3656_v19, %s2585_s27 }
 0x2a8   : > { %v1119_v21 = vpop.permute.xlu2 %1118  ;;  %v1367_v56 = vpop.permute.xlu0 %1366 }
 0x2a9   : > { %v1239_v58 = vpop.permute.xlu1 %1238  ;;  %1153 = vst.msk [vmem:[%s3198_s25 + $0xe0] sm:$0xff] %vm1138_vm4, %v1119_v21 }
 0x2aa   : > { %v1413_v63 = vsel %vm468_vm0, %v3437_v22, %v1239_v58 }
 0x2ab   : > { %v1429_v50 = vsel %vm485_vm2, %v1413_v63, %v1303_v0 }
 0x2ac   : > { %v1445_v14 = vsel %vm502_vm1, %v1429_v50, %v1367_v56  ;;  %v2328_v56 = vld [vmem:[%s2648_s26 + $0xc0] sm:$0xff] }
 0x2ad   : > { %2367 = vmatmul.msk.f32.gmra.mxu2 %vm524_vm3, %v1445_v14  ;;  %v2407_v50 = vld [vmem:[%s2648_s26 + $0x9a] sm:$0xff] }
 0x2ae   : > { %1825 = vrot.lane.b32.xlu0 %v3601_v62, %s2587_s29  ;;  %1316 = vrot.lane.b32.xlu2 %v3487_v29, %s2586_s28 }
 0x2af   : > { %1252 = vrot.lane.b32.xlu1 %v2324_v16, %s2585_s27 }
 0x2b0   : > { %v1752_v26 = vpop.permute.xlu2 %1751  ;;  %v1115_v11 = vpop.permute.xlu0 %1114 }
 0x2b1   : > { %v1686_v22 = vpop.permute.xlu1 %1685  ;;  %1151 = vst.msk [vmem:[%s3198_s25 + $0xc0] sm:$0xff] %vm1138_vm4, %v1115_v11 }
 0x2b2   : > { %v1855_v48 = vsel %vm468_vm0, %v2404_v36, %v1686_v22 }
 0x2b3   : > { %v1871_v53 = vsel %vm485_vm2, %v1855_v48, %v1750_v18 }
 0x2b6   : > { %1380 = vrot.lane.b32.xlu0 %v2322_v51, %s2587_s29  ;;  %1763 = vrot.lane.b32.xlu2 %v3681_v57, %s2586_s28  ;;  %v2405_v51 = vld [vmem:[%s2648_s26 + $0x82] sm:$0xff] }
 0x2b7   : > { %1699 = vrot.lane.b32.xlu1 %v3684_v10, %s2585_s27 }
 0x2b8   : > { %v1307_v9 = vpop.permute.xlu2 %1306  ;;  %v1814_v44 = vpop.permute.xlu0 %1813 }
 0x2b9   : > { %v1117_v39 = vpop.permute.xlu1 %1116  ;;  %v1887_v31 = vsel %vm502_vm1, %v1871_v53, %v1814_v44 }
 0x2ba   : > { %1152 = vst.msk [vmem:[%s3198_s25 + $0xc8] sm:$0xff] %vm1138_vm4, %v1117_v39  ;;  %2470 = vmatmul.msk.f32.gmra.mxu3 %vm524_vm3, %v1887_v31  ;;  %v2330_v31 = vld [vmem:[%s2648_s26 + $0xd8] sm:$0xff] }
 0x2be   : > { %1827 = vrot.lane.b32.xlu0 %v3630_v47, %s2587_s29  ;;  %1318 = vrot.lane.b32.xlu2 %v3521_v46, %s2586_s28 }
 0x2bf   : > { %1254 = vrot.lane.b32.xlu1 %v2325_v2, %s2585_s27 }
 0x2c0   : > { %v1754_v1 = vpop.permute.xlu2 %1753  ;;  %v1369_v25 = vpop.permute.xlu0 %1368 }
 0x2c1   : > { %v1241_v34 = vpop.permute.xlu1 %1240 }
 0x2c2   : > { %v1414_v54 = vsel %vm468_vm0, %v3453_v33, %v1241_v34 }
 0x2c3   : > { %v1430_v23 = vsel %vm485_vm2, %v1414_v54, %v1305_v15 }
 0x2c4   : > { %v1446_v0 = vsel %vm502_vm1, %v1430_v23, %v1369_v25 }
 0x2c5   : > { %2368 = vmatmul.msk.f32.gmra.mxu2 %vm524_vm3, %v1446_v0  ;;  %v2331_v0 = vld [vmem:[%s2648_s26 + $0xe0] sm:$0xff] }
 0x2c6   : > { %1382 = vrot.lane.b32.xlu0 %v2323_v7, %s2587_s29  ;;  %1765 = vrot.lane.b32.xlu2 %v3379_v17, %s2586_s28 }
 0x2c7   : > { %1701 = vrot.lane.b32.xlu1 %v3707_v35, %s2585_s27 }
 0x2c8   : > { %v1309_v37 = vpop.permute.xlu2 %1308  ;;  %v1121_v33 = vpop.permute.xlu0 %1120 }
 0x2c9   : > { %v1688_v12 = vpop.permute.xlu1 %1687  ;;  %1154 = vst.msk [vmem:[%s3198_s25 + $0xe8] sm:$0xff] %vm1138_vm4, %v1121_v33 }
 0x2ca   : > { %v1856_v13 = vsel %vm468_vm0, %v2405_v51, %v1688_v12 }
 0x2cb   : > { %v1872_v17 = vsel %vm485_vm2, %v1856_v13, %v1752_v26  ;;  %v2329_v26 = vld [vmem:[%s2648_s26 + $0xc8] sm:$0xff] }
 0x2ce   : > { %1829 = vrot.lane.b32.xlu0 %v3656_v19, %s2587_s29  ;;  %1320 = vrot.lane.b32.xlu2 %v3544_v6, %s2586_s28 }
 0x2cf   : > { %1256 = vrot.lane.b32.xlu1 %v2326_v24, %s2585_s27 }
 0x2d0   : > { %v1756_v3 = vpop.permute.xlu2 %1755  ;;  %v1816_v28 = vpop.permute.xlu0 %1815 }
 0x2d1   : > { %v1243_v43 = vpop.permute.xlu1 %1242  ;;  %v1888_v52 = vsel %vm502_vm1, %v1872_v17, %v1816_v28 }
 0x2d2   : > { %2471 = vmatmul.msk.f32.gmra.mxu3 %vm524_vm3, %v1888_v52  ;;  %v1415_v42 = vsel %vm468_vm0, %v3469_v4, %v1243_v43 }
 0x2d3   : > { %v1431_v8 = vsel %vm485_vm2, %v1415_v42, %v1307_v9 }
 0x2d6   : > { %1384 = vrot.lane.b32.xlu0 %v2324_v16, %s2587_s29  ;;  %1767 = vrot.lane.b32.xlu2 %v3394_v49, %s2586_s28 }
 0x2d7   : > { %1703 = vrot.lane.b32.xlu1 %v3731_v45, %s2585_s27 }
 0x2d8   : > { %v1311_v18 = vpop.permute.xlu2 %1310  ;;  %v1371_v27 = vpop.permute.xlu0 %1370 }
 0x2d9   : > { %v1690_v55 = vpop.permute.xlu1 %1689  ;;  %v1447_v7 = vsel %vm502_vm1, %v1431_v8, %v1371_v27 }
 0x2da   : > { %2369 = vmatmul.msk.f32.gmra.mxu2 %vm524_vm3, %v1447_v7  ;;  %v1857_v4 = vsel %vm468_vm0, %v2406_v32, %v1690_v55 }
 0x2db   : > { %v1873_v49 = vsel %vm485_vm2, %v1857_v4, %v1754_v1 }
 0x2de   : > { %1831 = vrot.lane.b32.xlu0 %v3684_v10, %s2587_s29  ;;  %1322 = vrot.lane.b32.xlu2 %v3573_v41, %s2586_s28 }
 0x2df   : > { %1258 = vrot.lane.b32.xlu1 %v2327_v61, %s2585_s27 }
 0x2e0   : > { %v1758_v15 = vpop.permute.xlu2 %1757  ;;  %v1818_v30 = vpop.permute.xlu0 %1817 }
 0x2e1   : > { %v1245_v5 = vpop.permute.xlu1 %1244  ;;  %v1889_v20 = vsel %vm502_vm1, %v1873_v49, %v1818_v30 }
 0x2e2   : > { %2472 = vmatmul.msk.f32.gmra.mxu3 %vm524_vm3, %v1889_v20  ;;  %v1416_v21 = vsel %vm468_vm0, %v3501_v38, %v1245_v5 }
 0x2e3   : > { %v1432_v58 = vsel %vm485_vm2, %v1416_v21, %v1309_v37 }
 0x2e5   : > { %v1965_v11 = vpop.f32.mrf.mxu3 }
 0x2e6   : > { %1386 = vrot.lane.b32.xlu0 %v2325_v2, %s2587_s29  ;;  %1324 = vrot.lane.b32.xlu2 %v3601_v62, %s2586_s28 }
 0x2e7   : > { %1260 = vrot.lane.b32.xlu1 %v2328_v56, %s2585_s27 }
 0x2e8   : > { %v1313_v63 = vpop.permute.xlu2 %1312  ;;  %v1373_v14 = vpop.permute.xlu0 %1372 }
 0x2e9   : > { %v1692_v16 = vpop.permute.xlu1 %1691  ;;  %v1448_v36 = vsel %vm502_vm1, %v1432_v58, %v1373_v14  ;;  %v2410_v58 = vld [vmem:[%s2648_s26 + $0xc2] sm:$0xff] }
 0x2ea   : > { %2370 = vmatmul.msk.f32.gmra.mxu2 %vm524_vm3, %v1448_v36  ;;  %v1858_v38 = vsel %vm468_vm0, %v2407_v50, %v1692_v16 }
 0x2eb   : > { %v1874_v22 = vsel %vm485_vm2, %v1858_v38, %v1756_v3  ;;  %v1966_v3 = vadd.f32 %v3190_v60, %v1965_v11 }
 0x2ee   : > { %1388 = vrot.lane.b32.xlu0 %v2326_v24, %s2587_s29  ;;  %1326 = vrot.lane.b32.xlu2 %v3630_v47, %s2586_s28  ;;  %v1968_v1 = vpop.f32.mrf.mxu3 }
 0x2ef   : > { %1262 = vrot.lane.b32.xlu1 %v2329_v26, %s2585_s27  ;;  %v1969_v17 = vadd.f32 %v3190_v60, %v1968_v1  ;;  %v3807_v60 = vld [vmem:[%s4008_s2] ss:$0 sm:$0xff] }
 0x2f0   : > { %v1760_v48 = vpop.permute.xlu2 %1759  ;;  %v1820_v53 = vpop.permute.xlu0 %1819 }
 0x2f1   : > { %v1247_v9 = vpop.permute.xlu1 %1246  ;;  %v1890_v44 = vsel %vm502_vm1, %v1874_v22, %v1820_v53 }
 0x2f2   : > { %2473 = vmatmul.msk.f32.gmra.mxu3 %vm524_vm3, %v1890_v44  ;;  %v1417_v39 = vsel %vm468_vm0, %v3461_v59, %v1247_v9 }
 0x2f3   : > { %v1433_v2 = vsel %vm485_vm2, %v1417_v39, %v1311_v18 }
 0x2f6   : > { %1390 = vrot.lane.b32.xlu0 %v2327_v61, %s2587_s29  ;;  %1328 = vrot.lane.b32.xlu2 %v3656_v19, %s2586_s28 }
 0x2f7   : > { %1264 = vrot.lane.b32.xlu1 %v2330_v31, %s2585_s27  ;;  %v2411_v31 = vld [vmem:[%s2648_s26 + $0xca] sm:$0xff] }
 0x2f8   : > { %v1315_v25 = vpop.permute.xlu2 %1314  ;;  %v1375_v34 = vpop.permute.xlu0 %1374 }
 0x2f9   : > { %v1694_v54 = vpop.permute.xlu1 %1693  ;;  %v1449_v23 = vsel %vm502_vm1, %v1433_v2, %v1375_v34 }
 0x2fa   : > { %2371 = vmatmul.msk.f32.gmra.mxu2 %vm524_vm3, %v1449_v23  ;;  %v1859_v59 = vsel %vm468_vm0, %v3653_v40, %v1694_v54 }
 0x2fb   : > { %v1875_v37 = vsel %vm485_vm2, %v1859_v59, %v1758_v15 }
 0x2fe   : > { %1392 = vrot.lane.b32.xlu0 %v2328_v56, %s2587_s29  ;;  %1330 = vrot.lane.b32.xlu2 %v3684_v10, %s2586_s28  ;;  %v1971_v51 = vpop.f32.mrf.mxu3 }
 0x2ff   : > { %1266 = vrot.lane.b32.xlu1 %v2331_v0, %s2585_s27  ;;  %v1972_v32 = vadd.f32 %v3807_v60, %v1971_v51 }
 0x300   : > { %v1762_v33 = vpop.permute.xlu2 %1761  ;;  %v1822_v12 = vpop.permute.xlu0 %1821 }
 0x301   : > { %v1249_v13 = vpop.permute.xlu1 %1248  ;;  %v1891_v24 = vsel %vm502_vm1, %v1875_v37, %v1822_v12 }
 0x302   : > { %2474 = vmatmul.msk.f32.gmra.mxu3 %vm524_vm3, %v1891_v24  ;;  %v1418_v40 = vsel %vm468_vm0, %v3487_v29, %v1249_v13  ;;  %v2412_v13 = vld [vmem:[%s2648_s26 + $0xda] sm:$0xff] }
 0x303   : > { %v1434_v28 = vsel %vm485_vm2, %v1418_v40, %v1313_v63 }
 0x306   : > { %1394 = vrot.lane.b32.xlu0 %v2329_v26, %s2587_s29  ;;  %2031 = vrot.lane.b32.xlu2 %v1969_v17, %s2585_s27  ;;  %v1974_v18 = vpop.f32.mrf.mxu3 }
 0x307   : > { %2029 = vrot.lane.b32.xlu1 %v1966_v3, %s2585_s27  ;;  %v1975_v27 = vadd.f32 %v3807_v60, %v1974_v18 }
 0x308   : > { %v1317_v43 = vpop.permute.xlu2 %1316  ;;  %v1377_v52 = vpop.permute.xlu0 %1376 }
 0x309   : > { %v1696_v42 = vpop.permute.xlu1 %1695  ;;  %v1450_v8 = vsel %vm502_vm1, %v1434_v28, %v1377_v52 }
 0x30a   : > { %2372 = vmatmul.msk.f32.gmra.mxu2 %vm524_vm3, %v1450_v8  ;;  %v1860_v29 = vsel %vm468_vm0, %v3681_v57, %v1696_v42 }
 0x30b   : > { %v1876_v55 = vsel %vm485_vm2, %v1860_v29, %v1760_v48 }
 0x30e   : > { %2033 = vrot.lane.b32.xlu0 %v1972_v32, %s2585_s27 }
 0x30f   : > { %2035 = vrot.lane.b32.xlu1 %v1975_v27, %s2585_s27 }
 0x310   : > { %v1764_v7 = vpop.permute.xlu2 %1763  ;;  %v1824_v4 = vpop.permute.xlu0 %1823 }
 0x311   : > { %v1251_v57 = vpop.permute.xlu1 %1250  ;;  %v1892_v61 = vsel %vm502_vm1, %v1876_v55, %v1824_v4  ;;  %v2413_v4 = vld [vmem:[%s2648_s26 + $0xe2] sm:$0xff] }
 0x312   : > { %2475 = vmatmul.msk.f32.gmra.mxu3 %vm524_vm3, %v1892_v61  ;;  %v1419_v49 = vsel %vm468_vm0, %v3521_v46, %v1251_v57 }
 0x313   : > { %v1435_v20 = vsel %vm485_vm2, %v1419_v49, %v1315_v25 }
 0x315   : > { %v1528_v15 = vpop.f32.mrf.mxu2 }
 0x316   : > { %v1529_v30 = vadd.f32 %v3807_v60, %v1528_v15  ;;  %v1977_v5 = vpop.f32.mrf.mxu3 }
 0x317   : > { %v1978_v21 = vadd.f32 %v3807_v60, %v1977_v5 }
 0x318   : > { %2382 = vst.msk [vmem:[%s3198_s25 + $0x10] sm:$0xff] %vm468_vm0, %v1529_v30  ;;  %v1319_v56 = vpop.permute.xlu2 %1318  ;;  %v1379_v63 = vpop.permute.xlu0 %1378 }
 0x319   : > { %v1698_v50 = vpop.permute.xlu1 %1697  ;;  %2037 = vrot.lane.b32.xlu2 %v1978_v21, %s2585_s27  ;;  %v1451_v14 = vsel %vm502_vm1, %v1435_v20, %v1379_v63 }
 0x31a   : > { %2373 = vmatmul.msk.f32.gmra.mxu2 %vm524_vm3, %v1451_v14  ;;  %v1861_v46 = vsel %vm468_vm0, %v2410_v58, %v1698_v50 }
 0x31b   : > { %v1877_v16 = vsel %vm485_vm2, %v1861_v46, %v1762_v33 }
 0x320   : > { %v1766_v36 = vpop.permute.xlu2 %1765  ;;  %v1826_v38 = vpop.permute.xlu0 %1825 }
 0x321   : > { %v1253_v26 = vpop.permute.xlu1 %1252  ;;  %v1893_v11 = vsel %vm502_vm1, %v1877_v16, %v1826_v38 }
 0x322   : > { %2476 = vmatmul.msk.f32.gmra.mxu3 %vm524_vm3, %v1893_v11  ;;  %v1420_v22 = vsel %vm468_vm0, %v3544_v6, %v1253_v26 }
 0x323   : > { %v1436_v9 = vsel %vm485_vm2, %v1420_v22, %v1317_v43 }
 0x325   : > { %v1980_v48 = vpop.f32.mrf.mxu3 }
 0x326   : > { %v1981_v53 = vadd.f32 %v3807_v60, %v1980_v48 }
 0x328   : > { %v1321_v44 = vpop.permute.xlu2 %1320  ;;  %2039 = vrot.lane.b32.xlu0 %v1981_v53, %s2585_s27  ;;  %v1381_v39 = vpop.permute.xlu0 %1380 }
 0x329   : > { %v1700_v2 = vpop.permute.xlu1 %1699  ;;  %v1452_v1 = vsel %vm502_vm1, %v1436_v9, %v1381_v39 }
 0x32a   : > { %2374 = vmatmul.msk.f32.gmra.mxu2 %vm524_vm3, %v1452_v1  ;;  %v1862_v25 = vsel %vm468_vm0, %v2411_v31, %v1700_v2 }
 0x32b   : > { %v1878_v6 = vsel %vm485_vm2, %v1862_v25, %v1764_v7 }
 0x330   : > { %v1531_v34 = vpop.f32.mrf.mxu2  ;;  %v1768_v54 = vpop.permute.xlu2 %1767 }
 0x331   : > { %v1532_v23 = vadd.f32 %v3807_v60, %v1531_v34  ;;  %v1255_v59 = vpop.permute.xlu1 %1254  ;;  %v1828_v0 = vpop.permute.xlu0 %1827 }
 0x332   : > { %v1894_v37 = vsel %vm502_vm1, %v1878_v6, %v1828_v0  ;;  %v1421_v51 = vsel %vm468_vm0, %v3573_v41, %v1255_v59 }
 0x333   : > { %2383 = vst.msk [vmem:[%s3198_s25 + $0x18] sm:$0xff] %vm468_vm0, %v1532_v23  ;;  %2477 = vmatmul.msk.f32.gmra.mxu3 %vm524_vm3, %v1894_v37  ;;  %v1437_v33 = vsel %vm485_vm2, %v1421_v51, %v1319_v56 }
 0x338   : > { %v1323_v12 = vpop.permute.xlu2 %1322 }
 0x339   : > { %v1702_v24 = vpop.permute.xlu1 %1701  ;;  %v1383_v40 = vpop.permute.xlu0 %1382 }
 0x33a   : > { %v1453_v17 = vsel %vm502_vm1, %v1437_v33, %v1383_v40  ;;  %v1863_v3 = vsel %vm468_vm0, %v2412_v13, %v1702_v24 }
 0x33b   : > { %2375 = vmatmul.msk.f32.gmra.mxu2 %vm524_vm3, %v1453_v17  ;;  %v1879_v52 = vsel %vm485_vm2, %v1863_v3, %v1766_v36 }
 0x33d   : > { %v1983_v28 = vpop.f32.mrf.mxu3 }
 0x33e   : > { %v1984_v43 = vadd.f32 %v3807_v60, %v1983_v28 }
 0x340   : > { %v1325_v41 = vpop.permute.xlu2 %1324  ;;  %2041 = vrot.lane.b32.xlu1 %v1984_v43, %s2585_s27 }
 0x341   : > { %v1257_v42 = vpop.permute.xlu1 %1256  ;;  %v1830_v8 = vpop.permute.xlu0 %1829 }
 0x342   : > { %v1895_v18 = vsel %vm502_vm1, %v1879_v52, %v1830_v8  ;;  %v1422_v29 = vsel %vm468_vm0, %v3601_v62, %v1257_v42 }
 0x343   : > { %2478 = vmatmul.msk.f32.gmra.mxu3 %vm524_vm3, %v1895_v18  ;;  %v1438_v32 = vsel %vm485_vm2, %v1422_v29, %v1321_v44 }
 0x348   : > { %v1534_v27 = vpop.f32.mrf.mxu2  ;;  %v1327_v55 = vpop.permute.xlu2 %1326 }
 0x349   : > { %v1535_v7 = vadd.f32 %v3807_v60, %v1534_v27  ;;  %v1704_v57 = vpop.permute.xlu1 %1703  ;;  %v1385_v61 = vpop.permute.xlu0 %1384 }
 0x34a   : > { %v1454_v49 = vsel %vm502_vm1, %v1438_v32, %v1385_v61  ;;  %v1864_v15 = vsel %vm468_vm0, %v2413_v4, %v1704_v57 }
 0x34b   : > { %2384 = vst.msk [vmem:[%s3198_s25 + $0x30] sm:$0xff] %vm468_vm0, %v1535_v7  ;;  %2376 = vmatmul.msk.f32.gmra.mxu2 %vm524_vm3, %v1454_v49  ;;  %v1880_v30 = vsel %vm485_vm2, %v1864_v15, %v1768_v54 }
 0x350   : > { %v3869_v62 = vpop.permute.xlu2 %1328 }
 0x351   : > { %v1259_v5 = vpop.permute.xlu1 %1258  ;;  %v1832_v20 = vpop.permute.xlu0 %1831 }
 0x352   : > { %v1896_v21 = vsel %vm502_vm1, %v1880_v30, %v1832_v20  ;;  %v1423_v63 = vsel %vm468_vm0, %v3630_v47, %v1259_v5 }
 0x353   : > { %2479 = vmatmul.msk.f32.gmra.mxu3 %vm524_vm3, %v1896_v21  ;;  %v1439_v16 = vsel %vm485_vm2, %v1423_v63, %v1323_v12 }
 0x355   : > { %v1986_v56 = vpop.f32.mrf.mxu3 }
 0x356   : > { %v1987_v58 = vadd.f32 %v3807_v60, %v1986_v56 }
 0x358   : > { %v3876_v50 = vpop.permute.xlu2 %1330  ;;  %2043 = vrot.lane.b32.xlu2 %v1987_v58, %s2585_s27 }
 0x359   : > { %v1261_v14 = vpop.permute.xlu1 %1260  ;;  %v1387_v46 = vpop.permute.xlu0 %1386 }
 0x35a   : > { %v1455_v36 = vsel %vm502_vm1, %v1439_v16, %v1387_v46  ;;  %v1424_v11 = vsel %vm468_vm0, %v3656_v19, %v1261_v14 }
 0x35b   : > { %2377 = vmatmul.msk.f32.gmra.mxu2 %vm524_vm3, %v1455_v36  ;;  %v1440_v53 = vsel %vm485_vm2, %v1424_v11, %v1325_v41 }
 0x35d   : > { %v1537_v38 = vpop.f32.mrf.mxu2 }
 0x35e   : > { %v1538_v26 = vadd.f32 %v3807_v60, %v1537_v38 }
 0x360   : > { %2385 = vst.msk [vmem:[%s3198_s25 + $0x38] sm:$0xff] %vm468_vm0, %v1538_v26  ;;  %v2032_v47 = vpop.permute.xlu2 %2031 }
 0x361   : > { %v1263_v22 = vpop.permute.xlu1 %1262  ;;  %2481 = vst.msk [vmem:[%s3198_s25 + $0x18] sm:$0xff] %vm1138_vm4, %v2032_v47  ;;  %v1389_v48 = vpop.permute.xlu0 %1388 }
 0x362   : > { %v1456_v9 = vsel %vm502_vm1, %v1440_v53, %v1389_v48  ;;  %v1425_v44 = vsel %vm468_vm0, %v3684_v10, %v1263_v22 }
 0x363   : > { %2378 = vmatmul.msk.f32.gmra.mxu2 %vm524_vm3, %v1456_v9  ;;  %v1441_v31 = vsel %vm485_vm2, %v1425_v44, %v1327_v55 }
 0x365   : > { %v1989_v39 = vpop.f32.mrf.mxu3 }
 0x366   : > { %v1990_v19 = vadd.f32 %v3807_v60, %v1989_v39 }
 0x368   : > { %2045 = vrot.lane.b32.xlu0 %v1990_v19, %s2585_s27 }
 0x369   : > { %v1265_v2 = vpop.permute.xlu1 %1264  ;;  %v1391_v1 = vpop.permute.xlu0 %1390 }
 0x36a   : > { %v1457_v25 = vsel %vm502_vm1, %v1441_v31, %v1391_v1  ;;  %v1426_v43 = vsel %vm468_vm0, %v3707_v35, %v1265_v2 }
 0x36b   : > { %2379 = vmatmul.msk.f32.gmra.mxu2 %vm524_vm3, %v1457_v25  ;;  %v1442_v52 = vsel %vm485_vm2, %v1426_v43, %v3869_v62 }
 0x36d   : > { %v1540_v6 = vpop.f32.mrf.mxu2 }
 0x36e   : > { %v1541_v10 = vadd.f32 %v3807_v60, %v1540_v6 }
 0x370   : > { %2386 = vst.msk [vmem:[%s3198_s25 + $0x50] sm:$0xff] %vm468_vm0, %v1541_v10 }
 0x371   : > { %v1267_v34 = vpop.permute.xlu1 %1266  ;;  %v1393_v54 = vpop.permute.xlu0 %1392 }
 0x372   : > { %v1458_v42 = vsel %vm502_vm1, %v1442_v52, %v1393_v54  ;;  %v1427_v35 = vsel %vm468_vm0, %v3731_v45, %v1267_v34 }
 0x373   : > { %v2038_v23 = vpop.permute.xlu2 %2037  ;;  %2380 = vmatmul.msk.f32.gmra.mxu2 %vm524_vm3, %v1458_v42  ;;  %v1443_v27 = vsel %vm485_vm2, %v1427_v35, %v3876_v50 }
 0x374   : > { %2484 = vst.msk [vmem:[%s3198_s25 + $0x50] sm:$0xff] %vm1138_vm4, %v2038_v23 }
 0x375   : > { %v1992_v59 = vpop.f32.mrf.mxu3 }
 0x376   : > { %v1993_v0 = vadd.f32 %v3807_v60, %v1992_v59 }
 0x378   : > { %2047 = vrot.lane.b32.xlu1 %v1993_v0, %s2585_s27 }
 0x379   : > { %v2030_v37 = vpop.permute.xlu1 %2029  ;;  %v1395_v51 = vpop.permute.xlu0 %1394 }
 0x37a   : > { %2480 = vst.msk [vmem:[%s3198_s25 + $0x10] sm:$0xff] %vm1138_vm4, %v2030_v37  ;;  %v1459_v55 = vsel %vm502_vm1, %v1443_v27, %v1395_v51 }
 0x37b   : > { %2381 = vmatmul.msk.f32.gmra.mxu2 %vm524_vm3, %v1459_v55 }
 0x37d   : > { %v1543_v33 = vpop.f32.mrf.mxu2 }
 0x37e   : > { %v1544_v12 = vadd.f32 %v3807_v60, %v1543_v33 }
 0x380   : > { %2387 = vst.msk [vmem:[%s3198_s25 + $0x58] sm:$0xff] %vm468_vm0, %v1544_v12 }
 0x381   : > { %v2036_v13 = vpop.permute.xlu1 %2035  ;;  %v2034_v24 = vpop.permute.xlu0 %2033 }
 0x382   : > { %2483 = vst.msk [vmem:[%s3198_s25 + $0x38] sm:$0xff] %vm1138_vm4, %v2036_v13 }
 0x383   : > { %2482 = vst.msk [vmem:[%s3198_s25 + $0x30] sm:$0xff] %vm1138_vm4, %v2034_v24 }
 0x385   : > { %v1995_v40 = vpop.f32.mrf.mxu3 }
 0x386   : > { %v1996_v17 = vadd.f32 %v3807_v60, %v1995_v40 }
 0x388   : > { %2049 = vrot.lane.b32.xlu2 %v1996_v17, %s2585_s27 }
 0x38d   : > { %v1546_v3 = vpop.f32.mrf.mxu2 }
 0x38e   : > { %v1547_v28 = vadd.f32 %v3807_v60, %v1546_v3 }
 0x390   : > { %2388 = vst.msk [vmem:[%s3198_s25 + $0x70] sm:$0xff] %vm468_vm0, %v1547_v28 }
 0x395   : > { %v1998_v41 = vpop.f32.mrf.mxu3 }
 0x396   : > { %v1999_v8 = vadd.f32 %v3807_v60, %v1998_v41 }
 0x398   : > { %2051 = vrot.lane.b32.xlu0 %v1999_v8, %s2585_s27 }
 0x39a   : > { %v2040_v18 = vpop.permute.xlu0 %2039 }
 0x39b   : > { %2485 = vst.msk [vmem:[%s3198_s25 + $0x58] sm:$0xff] %vm1138_vm4, %v2040_v18 }
 0x39d   : > { %v1549_v29 = vpop.f32.mrf.mxu2 }
 0x39e   : > { %v1550_v32 = vadd.f32 %v3807_v60, %v1549_v29 }
 0x3a0   : > { %2389 = vst.msk [vmem:[%s3198_s25 + $0x78] sm:$0xff] %vm468_vm0, %v1550_v32 }
 0x3a5   : > { %v2001_v7 = vpop.f32.mrf.mxu3 }
 0x3a6   : > { %v2002_v4 = vadd.f32 %v3807_v60, %v2001_v7 }
 0x3a8   : > { %2053 = vrot.lane.b32.xlu1 %v2002_v4, %s2585_s27 }
 0x3ad   : > { %v1552_v57 = vpop.f32.mrf.mxu2 }
 0x3ae   : > { %v1553_v45 = vadd.f32 %v3807_v60, %v1552_v57 }
 0x3b0   : > { %2390 = vst.msk [vmem:[%s3198_s25 + $0x90] sm:$0xff] %vm468_vm0, %v1553_v45 }
 0x3b2   : > { %v2042_v61 = vpop.permute.xlu1 %2041  ;;  %v2044_v49 = vpop.permute.xlu2 %2043 }
 0x3b3   : > { %2486 = vst.msk [vmem:[%s3198_s25 + $0x70] sm:$0xff] %vm1138_vm4, %v2042_v61 }
 0x3b4   : > { %2487 = vst.msk [vmem:[%s3198_s25 + $0x78] sm:$0xff] %vm1138_vm4, %v2044_v49 }
 0x3b6   : > { %v2004_v15 = vpop.f32.mrf.mxu3 }
 0x3b7   : > { %v2005_v30 = vadd.f32 %v3807_v60, %v2004_v15 }
 0x3b9   : > { %2055 = vrot.lane.b32.xlu2 %v2005_v30, %s2585_s27 }
 0x3be   : > { %v1555_v62 = vpop.f32.mrf.mxu2 }
 0x3bf   : > { %v1556_v5 = vadd.f32 %v3807_v60, %v1555_v62 }
 0x3c1   : > { %2391 = vst.msk [vmem:[%s3198_s25 + $0x98] sm:$0xff] %vm468_vm0, %v1556_v5 }
 0x3c6   : > { %v2007_v20 = vpop.f32.mrf.mxu3 }
 0x3c7   : > { %v2008_v21 = vadd.f32 %v3807_v60, %v2007_v20 }
 0x3c9   : > { %2057 = vrot.lane.b32.xlu0 %v2008_v21, %s2585_s27 }
 0x3ce   : > { %v1558_v56 = vpop.f32.mrf.mxu2 }
 0x3cf   : > { %v1559_v58 = vadd.f32 %v3807_v60, %v1558_v56 }
 0x3d1   : > { %2392 = vst.msk [vmem:[%s3198_s25 + $0xb0] sm:$0xff] %vm468_vm0, %v1559_v58 }
 0x3d6   : > { %v2010_v63 = vpop.f32.mrf.mxu3 }
 0x3d7   : > { %v2011_v50 = vadd.f32 %v3807_v60, %v2010_v63 }
 0x3d9   : > { %2059 = vrot.lane.b32.xlu1 %v2011_v50, %s2585_s27 }
 0x3da   : > { %v2046_v14 = vpop.permute.xlu0 %2045 }
 0x3db   : > { %2488 = vst.msk [vmem:[%s3198_s25 + $0x90] sm:$0xff] %vm1138_vm4, %v2046_v14 }
 0x3de   : > { %v1561_v46 = vpop.f32.mrf.mxu2 }
 0x3df   : > { %v1562_v16 = vadd.f32 %v3807_v60, %v1561_v46 }
 0x3e1   : > { %2393 = vst.msk [vmem:[%s3198_s25 + $0xb8] sm:$0xff] %vm468_vm0, %v1562_v16 }
 0x3e2   : > { %v2050_v36 = vpop.permute.xlu2 %2049 }
 0x3e3   : > { %2490 = vst.msk [vmem:[%s3198_s25 + $0xb0] sm:$0xff] %vm1138_vm4, %v2050_v36 }
 0x3e6   : > { %v1564_v38 = vpop.f32.mrf.mxu2 }
 0x3e7   : > { %v1565_v26 = vadd.f32 %v3807_v60, %v1564_v38 }
 0x3e9   : > { %2394 = vst.msk [vmem:[%s3198_s25 + $0xd0] sm:$0xff] %vm468_vm0, %v1565_v26 }
 0x3ea   : > { %v2048_v11 = vpop.permute.xlu1 %2047 }
 0x3eb   : > { %2489 = vst.msk [vmem:[%s3198_s25 + $0x98] sm:$0xff] %vm1138_vm4, %v2048_v11 }
 0x3ee   : > { %v1567_v47 = vpop.f32.mrf.mxu2 }
 0x3ef   : > { %v1568_v22 = vadd.f32 %v3807_v60, %v1567_v47 }
 0x3f1   : > { %2395 = vst.msk [vmem:[%s3198_s25 + $0xd8] sm:$0xff] %vm468_vm0, %v1568_v22 }
 0x3f6   : > { %v1570_v9 = vpop.f32.mrf.mxu2 }
 0x3f7   : > { %v1571_v39 = vadd.f32 %v3807_v60, %v1570_v9 }
 0x3f9   : > { %2396 = vst.msk [vmem:[%s3198_s25 + $0xf0] sm:$0xff] %vm468_vm0, %v1571_v39 }
 0x3fe   : > { %v1573_v19 = vpop.f32.mrf.mxu2 }
 0x3ff   : > { %v1574_v31 = vadd.f32 %v3807_v60, %v1573_v19 }
 0x401   : > { %2397 = vst.msk [vmem:[%s3198_s25 + $0xf8] sm:$0xff] %vm468_vm0, %v1574_v31 }
 0x40a   : > { %v2052_v48 = vpop.permute.xlu0 %2051 }
 0x40b   : > { %2491 = vst.msk [vmem:[%s3198_s25 + $0xb8] sm:$0xff] %vm1138_vm4, %v2052_v48 }
 0x413   : > { %v2056_v53 = vpop.permute.xlu2 %2055 }
 0x414   : > { %2493 = vst.msk [vmem:[%s3198_s25 + $0xd8] sm:$0xff] %vm1138_vm4, %v2056_v53 }
 0x41a   : > { %v2054_v44 = vpop.permute.xlu1 %2053 }
 0x41b   : > { %2492 = vst.msk [vmem:[%s3198_s25 + $0xd0] sm:$0xff] %vm1138_vm4, %v2054_v44 }
 0x43b   : > { %v2058_v2 = vpop.permute.xlu0 %2057 }
 0x43c   : > { %2494 = vst.msk [vmem:[%s3198_s25 + $0xf0] sm:$0xff] %vm1138_vm4, %v2058_v2 }
 0x44b   : > { %v2060_v1 = vpop.permute.xlu1 %2059 }
 0x44c   : > { %2495 = vst.msk [vmem:[%s3198_s25 + $0xf8] sm:$0xff] %vm1138_vm4, %v2060_v1 }
 0x44d PF: > { %s13_s16 = sadd.s32 1, %s2583_s16   ;;  %s4038_s12 = smov %s2575_s14 }
 0x44e   : > { %p10_p8 = scmp.ge.s32.totalorder %s13_s16, 6   ;;  %s4039_s13 = smov %s2579_s15 }
 0x44f   : > { %s4040_s14 = smov %s4043_s17  ;;  %s4041_s15 = smov %s4047_s18 }
 0x450   :  { %12 = sbr.rel (!%p10_p8) target bundleno = 3 (0x3), region = 68 }

</bundles_post_ra>
